<compile_context>
chip_gen: v7x
topology: tpu7x:2x2x1
jax: 0.10.0
libtpu: 0.0.40
codegen_flags: <defaults>
</compile_context>

<pallas_src>
import functools

import jax
import jax.numpy as jnp
from jax import lax
from jax.experimental import pallas as pl
from jax.experimental.pallas import tpu as pltpu


def _sublane(dtype):
    # Rows per sublane tile for a given dtype (8 for f32, 16 for bf16, ...).
    return max(8, 32 // jnp.dtype(dtype).itemsize)


def _round_up(x, m):
    return (x + m - 1) // m * m


def _default_vmem_limit():
    # Generation-aware scoped-VMEM budget: ~48 MiB on 64 MiB chips (v7x),
    # ~96 MiB on 128 MiB chips (v5e / v6e).  Safe fallback: 64 MiB.
    try:
        cap = int(pltpu.get_tpu_info().vmem_capacity_bytes)
        return min(cap * 3 // 4, 96 * 1024 * 1024)
    except Exception:
        return 64 * 1024 * 1024


def _pick_tq(n, vmem_budget):
    # Largest 128-multiple row tile (<= 512) that divides N and whose
    # (tq, N)-sized f32 softmax temporaries (energy / e / p + slack) fit in
    # roughly a third of the VMEM budget.
    for t in (512, 384, 256, 128):
        if n % t == 0 and 16 * t * n <= vmem_budget // 3:
            return t
    if n % 128 == 0:
        return 128
    # TODO(synk): pad N to a multiple of 128 (with masked softmax columns)
    # instead of this untiled fallback; only acceptable for small N.
    return n


def sa_layer_kernel(x_ref, wq_ref, wv_ref, bv_ref, wt_ref, bt_ref, o_ref,
                    q_sc, acc_sc, xvs_sc, *, c, tq, n_tiles, ew_dtype):
    """One batch row, one row-tile of the attention per grid step."""
    i = pl.program_id(1)
    f32 = jnp.float32
    cdt = q_sc.dtype                       # matmul-operand (compute) dtype

    @pl.when(i == 0)
    def _init():
        # q = k = Wq @ x for the whole row, resident in VMEM across row tiles.
        # Wq is zero-padded to a sublane multiple in the wrapper, so the extra
        # rows are exactly zero and contribute nothing to the energy.
        q_sc[...] = jnp.dot(wq_ref[...], x_ref[0],
                            preferred_element_type=f32).astype(cdt)
        acc_sc[...] = jnp.zeros_like(acc_sc)
        # [x_v ; ones ; 0-pad] operand: the ones row makes the MXU emit the
        # column sums of the softmax (torch's attention.sum(dim=1)) for free.
        row_ids = lax.broadcasted_iota(jnp.int32, xvs_sc.shape, 0)
        xvs_sc[...] = jnp.where(row_ids == c, 1.0, 0.0).astype(cdt)

    start = pl.multiple_of(i * tq, tq)
    x_t = x_ref[0, :, pl.ds(start, tq)]                      # (C, TQ)
    x_tc = x_t.astype(cdt)

    # v projection of this row tile (bias added in f32).
    x_v = jnp.dot(wv_ref[...], x_tc, preferred_element_type=f32) + bv_ref[...]

    # energy tile (TQ, N): contract the channel axis directly (no transpose
    # materialized); per-tile queries are sliced from the resident q scratch.
    q_t = q_sc[:, pl.ds(start, tq)]                          # (QR, TQ)
    energy = lax.dot_general(q_t, q_sc[...], (((0,), (0,)), ((), ())),
                             preferred_element_type=f32)     # (TQ, N)

    # Row softmax.  max / sum / reciprocal stay in f32; the N^2-scale exp and
    # multiply run in ew_dtype (bf16 on v6e/v7x halves EUP/VPU work + spills).
    row_max = jnp.max(energy, axis=-1, keepdims=True)        # (TQ, 1) f32
    e = jnp.exp((energy - row_max).astype(ew_dtype))         # (TQ, N)
    s = jnp.sum(e, axis=-1, keepdims=True, dtype=f32)        # (TQ, 1) f32
    r = pl.reciprocal(s, approx=False)                       # exact, O(TQ)
    p = (e * r.astype(ew_dtype)).astype(cdt)                 # (TQ, N)

    # Accumulate [x_v @ p ; colsum] with one MXU matmul into the f32 scratch.
    xvs_sc[0:c, :] = x_v.astype(cdt)
    acc_sc[...] += jnp.dot(xvs_sc[...], p, preferred_element_type=f32)

    @pl.when(i == n_tiles - 1)
    def _finalize():
        x_f = x_ref[0].astype(f32)                           # (C, N)
        # Fold the column renormalization into a (C, N) scale after the matmul.
        inv_col = pl.reciprocal(1e-9 + acc_sc[c:c + 1, :], approx=False)
        x_r = acc_sc[0:c, :] * inv_col                       # (C, N) f32
        diff = (x_f - x_r).astype(cdt)
        tr = jnp.dot(wt_ref[...], diff,
                     preferred_element_type=f32) + bt_ref[...]
        # NOTE: after_norm (BatchNorm1d) is unused in the reference forward.
        o_ref[0] = (x_f + jnp.maximum(tr, 0.0)).astype(o_ref.dtype)


def sa_layer(x, wq, wv, bv, wt, bt, *, tq=None, matmul_dtype=None,
             ew_dtype=jnp.float32, vmem_limit_bytes=None):
    """x: (B, C, N); wq: (C//4, C); wv, wt: (C, C); bv, bt: (C,).

    matmul_dtype: operand dtype fed to the MXU (None -> follow x.dtype).
                  Pass jnp.bfloat16 for the fast path on f32 inputs.
    ew_dtype:     dtype of the N^2-scale softmax element-wise ops
                  (keep f32 on v5e; bf16 recommended on v6e/v7x).
    """
    B, C, N = x.shape
    C4 = wq.shape[0]
    f32 = jnp.float32
    cdt = jnp.dtype(matmul_dtype) if matmul_dtype is not None else jnp.dtype(x.dtype)

    vmem_budget = int(vmem_limit_bytes or _default_vmem_limit())
    if tq is None:
        tq = _pick_tq(N, vmem_budget)
    assert N % tq == 0, "N must be divisible by the row-tile size tq"
    nt = N // tq

    sub = _sublane(cdt)
    qr = _round_up(C4, sub)          # q scratch rows (zero-padded -> exact)
    xr = _round_up(C + 1, sub)       # [x_v ; ones ; pad] rows

    # Hoisted weight padding / casting (done once, outside the kernel).
    wq_p = jnp.zeros((qr, C), cdt).at[:C4].set(wq.astype(cdt))
    wv_c = wv.astype(cdt)
    wt_c = wt.astype(cdt)
    bv2 = bv.astype(f32).reshape(C, 1)
    bt2 = bt.astype(f32).reshape(C, 1)

    kernel = functools.partial(sa_layer_kernel, c=C, tq=tq, n_tiles=nt,
                               ew_dtype=jnp.dtype(ew_dtype))

    w_item = jnp.dtype(cdt).itemsize
    x_item = jnp.dtype(x.dtype).itemsize
    cost = pl.CostEstimate(
        flops=int(2 * B * (qr * C * N + 2 * C * C * N
                           + C4 * N * N + (C + 1) * N * N)),
        transcendentals=int(B * N * N),
        bytes_accessed=int(2 * B * C * N * x_item
                           + (qr * C + 2 * C * C + 2 * C) * w_item))

    # NOTE(v7x): batch is the only parallel grid axis; keep >= 2 batch rows
    # per chip so both TensorCores have work.
    return pl.pallas_call(
        kernel,
        out_shape=jax.ShapeDtypeStruct((B, C, N), x.dtype),
        grid_spec=pltpu.PrefetchScalarGridSpec(
            num_scalar_prefetch=0,
            grid=(B, nt),
            in_specs=[
                pl.BlockSpec((1, C, N), lambda b, i: (b, 0, 0)),   # x (full row)
                pl.BlockSpec((qr, C), lambda b, i: (0, 0)),        # Wq (padded)
                pl.BlockSpec((C, C), lambda b, i: (0, 0)),         # Wv
                pl.BlockSpec((C, 1), lambda b, i: (0, 0)),         # bv
                pl.BlockSpec((C, C), lambda b, i: (0, 0)),         # Wt
                pl.BlockSpec((C, 1), lambda b, i: (0, 0)),         # bt
            ],
            out_specs=pl.BlockSpec((1, C, N), lambda b, i: (b, 0, 0)),
            scratch_shapes=[
                pltpu.VMEM((qr, N), cdt),               # q for the whole row
                pltpu.VMEM((xr, N), jnp.float32),       # [x_v@p ; colsum] acc
                pltpu.VMEM((xr, tq), cdt),              # [x_v ; ones] operand
            ]),
        compiler_params=pltpu.CompilerParams(
            dimension_semantics=("parallel", "arbitrary"),
            vmem_limit_bytes=vmem_budget),
        cost_estimate=cost,
    )(x, wq_p, wv_c, bv2, wt_c, bt2)


def sa_layer_ref(x, wq, wv, bv, wt, bt):
    """Pure-JAX mirror of the PyTorch forward (matmuls in the input dtype with
    f32 accumulation, element-wise math in f32)."""
    f32 = jnp.float32
    q = jnp.einsum("oc,bcn->bon", wq, x, preferred_element_type=f32)
    qc = q.astype(x.dtype)
    energy = jnp.einsum("bcn,bcm->bnm", qc, qc, preferred_element_type=f32)
    att = jax.nn.softmax(energy, axis=-1)
    att = att / (1e-9 + jnp.sum(att, axis=1, keepdims=True))
    xv = (jnp.einsum("oc,bcn->bon", wv, x, preferred_element_type=f32)
          + bv.astype(f32)[None, :, None])
    x_r = jnp.einsum("bcn,bnm->bcm", xv.astype(x.dtype), att.astype(x.dtype),
                     preferred_element_type=f32)
    diff = (x.astype(f32) - x_r).astype(x.dtype)
    tr = (jnp.einsum("oc,bcn->bon", wt, diff, preferred_element_type=f32)
          + bt.astype(f32)[None, :, None])
    return (x.astype(f32) + jnp.maximum(tr, 0.0)).astype(x.dtype)


if __name__ == "__main__":
    key = jax.random.PRNGKey(0)
    B, C, N = 2, 32, 256
    C4 = C // 4

    kx, k1, k2, k3, k4, k5 = jax.random.split(key, 6)
    x = jax.random.normal(kx, (B, C, N), dtype=jnp.float32)
    wq = jax.random.normal(k1, (C4, C), dtype=jnp.float32) * 0.1   # shared q/k
    wv = jax.random.normal(k2, (C, C), dtype=jnp.float32) * 0.1
    bv = jax.random.normal(k3, (C,), dtype=jnp.float32) * 0.1
    wt = jax.random.normal(k4, (C, C), dtype=jnp.float32) * 0.1
    bt = jax.random.normal(k5, (C,), dtype=jnp.float32) * 0.1

    ref = sa_layer_ref(x, wq, wv, bv, wt, bt)

    # 1) f32 path; tq=128 -> two row tiles per batch row (exercises the
    #    accumulator / init / finalize structure).
    out = jax.block_until_ready(sa_layer(x, wq, wv, bv, wt, bt, tq=128))
    assert out.shape == (B, C, N) and out.dtype == x.dtype
    assert jnp.allclose(out, ref, atol=2e-2, rtol=2e-2), \
        float(jnp.max(jnp.abs(out - ref)))

    # 2) f32 inputs with bf16 MXU operands (the MXU-native fast path).
    outb = jax.block_until_ready(
        sa_layer(x, wq, wv, bv, wt, bt, tq=128, matmul_dtype=jnp.bfloat16))
    assert jnp.allclose(outb, ref, atol=5e-2, rtol=5e-2), \
        float(jnp.max(jnp.abs(outb - ref)))

    # 3) bf16 inputs with bf16 element-wise softmax (v6e/v7x VPU/EUP path).
    xb = x.astype(jnp.bfloat16)
    pb = [a.astype(jnp.bfloat16) for a in (wq, wv, bv, wt, bt)]
    outc = jax.block_until_ready(
        sa_layer(xb, *pb, tq=128, ew_dtype=jnp.bfloat16))
    refc = sa_layer_ref(xb, *pb)
    assert jnp.allclose(outc.astype(jnp.float32), refc.astype(jnp.float32),
                        atol=5e-2, rtol=5e-2), \
        float(jnp.max(jnp.abs(outc.astype(jnp.float32) -
                              refc.astype(jnp.float32))))

    print("KERNEL_OK")
</pallas_src>

<mosaic_0001>
module attributes {stable_mosaic.version = 11 : i64} {
  func.func @sa_layer_kernel(%arg0: i32, %arg1: i32, %arg2: memref<1x32x256xf32, #tpu.memory_space<vmem>>, %arg3: memref<8x32xf32, #tpu.memory_space<vmem>>, %arg4: memref<32x32xf32, #tpu.memory_space<vmem>>, %arg5: memref<32x1xf32, #tpu.memory_space<vmem>>, %arg6: memref<32x32xf32, #tpu.memory_space<vmem>>, %arg7: memref<32x1xf32, #tpu.memory_space<vmem>>, %arg8: memref<1x32x256xf32, #tpu.memory_space<vmem>>, %arg9: memref<8x256xf32, #tpu.memory_space<vmem>>, %arg10: memref<40x256xf32, #tpu.memory_space<vmem>>, %arg11: memref<40x128xf32, #tpu.memory_space<vmem>>) attributes {dimension_semantics = [#tpu.dimension_semantics<parallel>, #tpu.dimension_semantics<arbitrary>], iteration_bounds = array<i64: 2, 2>, scalar_prefetch = 0 : i64, scratch_operands = 3 : i64, tpu.core_type = #tpu.core_type<tc>, window_params = [{transform_indices = @transform_0, window_bounds = array<i64: 1, 32, 256>}, {pipeline_mode = #tpu.pipeline_mode<synchronous>, transform_indices = @transform_1, window_bounds = array<i64: 8, 32>}, {pipeline_mode = #tpu.pipeline_mode<synchronous>, transform_indices = @transform_2, window_bounds = array<i64: 32, 32>}, {pipeline_mode = #tpu.pipeline_mode<synchronous>, transform_indices = @transform_3, window_bounds = array<i64: 32, 1>}, {pipeline_mode = #tpu.pipeline_mode<synchronous>, transform_indices = @transform_4, window_bounds = array<i64: 32, 32>}, {pipeline_mode = #tpu.pipeline_mode<synchronous>, transform_indices = @transform_5, window_bounds = array<i64: 32, 1>}, {transform_indices = @transform_6, window_bounds = array<i64: 1, 32, 256>}]} {
    %c0_i32 = arith.constant 0 : i32
    %0 = arith.cmpi eq, %arg1, %c0_i32 : i32
    %1 = arith.extui %0 : i1 to i32
    %c0_i32_0 = arith.constant 0 : i32
    %2 = arith.cmpi ne, %1, %c0_i32_0 : i32
    scf.if %2 {
      %c0_22 = arith.constant 0 : index
      %c0_23 = arith.constant 0 : index
      %36 = vector.load %arg3[%c0_22, %c0_23] : memref<8x32xf32, #tpu.memory_space<vmem>>, vector<8x32xf32>
      %c0_24 = arith.constant 0 : index
      %c0_25 = arith.constant 0 : index
      %c0_26 = arith.constant 0 : index
      %37 = vector.load %arg2[%c0_24, %c0_25, %c0_26] : memref<1x32x256xf32, #tpu.memory_space<vmem>>, vector<1x32x256xf32>
      %38 = vector.shape_cast %37 : vector<1x32x256xf32> to vector<32x256xf32>
      %cst_27 = arith.constant dense<0.000000e+00> : vector<8x256xf32>
      %39 = tpu.matmul %36, %38, %cst_27 {dimension_numbers = #tpu.dot_dimension_numbers<[1], [0], [0], [1], [0, 0, 1, 1], [], []>} : vector<8x32xf32>, vector<32x256xf32>, vector<8x256xf32> -> vector<8x256xf32>
      %c0_28 = arith.constant 0 : index
      %c0_29 = arith.constant 0 : index
      %40 = vector.load %arg9[%c0_28, %c0_29] : memref<8x256xf32, #tpu.memory_space<vmem>>, vector<8x256xf32>
      tpu.vector_store %arg9[%c0_28, %c0_29], %39 {strides = array<i32>} : memref<8x256xf32, #tpu.memory_space<vmem>>, vector<8x256xf32>,
      %cst_30 = arith.constant 0.000000e+00 : f32
      %41 = vector.broadcast %cst_30 : f32 to vector<40x256xf32>
      %c0_31 = arith.constant 0 : index
      %c0_32 = arith.constant 0 : index
      %42 = vector.load %arg10[%c0_31, %c0_32] : memref<40x256xf32, #tpu.memory_space<vmem>>, vector<40x256xf32>
      tpu.vector_store %arg10[%c0_31, %c0_32], %41 {strides = array<i32>} : memref<40x256xf32, #tpu.memory_space<vmem>>, vector<40x256xf32>,
      %43 = tpu.iota {dimensions = array<i32: 0>} : vector<40x128xi32>
      %c32_i32 = arith.constant 32 : i32
      %44 = vector.broadcast %c32_i32 : i32 to vector<40x128xi32>
      %45 = arith.cmpi eq, %43, %44 : vector<40x128xi32>
      %cst_33 = arith.constant 1.000000e+00 : f32
      %cst_34 = arith.constant 0.000000e+00 : f32
      %46 = vector.broadcast %cst_33 : f32 to vector<40x128xf32>
      %47 = vector.broadcast %cst_34 : f32 to vector<40x128xf32>
      %48 = arith.select %45, %46, %47 : vector<40x128xi1>, vector<40x128xf32>
      %c0_35 = arith.constant 0 : index
      %c0_36 = arith.constant 0 : index
      %49 = vector.load %arg11[%c0_35, %c0_36] : memref<40x128xf32, #tpu.memory_space<vmem>>, vector<40x128xf32>
      tpu.vector_store %arg11[%c0_35, %c0_36], %48 {strides = array<i32>} : memref<40x128xf32, #tpu.memory_space<vmem>>, vector<40x128xf32>,
    } else {
    }
    %c128_i32 = arith.constant 128 : i32
    %3 = arith.muli %arg1, %c128_i32 : i32
    %4 = tpu.assume_multiple %3, 128 : i32
    %c0 = arith.constant 0 : index
    %c0_1 = arith.constant 0 : index
    %5 = arith.index_cast %4 : i32 to index
    %6 = vector.load %arg2[%c0, %c0_1, %5] : memref<1x32x256xf32, #tpu.memory_space<vmem>>, vector<1x32x128xf32>
    %7 = vector.shape_cast %6 : vector<1x32x128xf32> to vector<32x128xf32>
    %c0_2 = arith.constant 0 : index
    %c0_3 = arith.constant 0 : index
    %8 = vector.load %arg4[%c0_2, %c0_3] : memref<32x32xf32, #tpu.memory_space<vmem>>, vector<32x32xf32>
    %cst = arith.constant dense<0.000000e+00> : vector<32x128xf32>
    %9 = tpu.matmul %8, %7, %cst {dimension_numbers = #tpu.dot_dimension_numbers<[1], [0], [0], [1], [0, 0, 1, 1], [], []>} : vector<32x32xf32>, vector<32x128xf32>, vector<32x128xf32> -> vector<32x128xf32>
    %c0_4 = arith.constant 0 : index
    %c0_5 = arith.constant 0 : index
    %10 = vector.load %arg5[%c0_4, %c0_5] : memref<32x1xf32, #tpu.memory_space<vmem>>, vector<32x1xf32>
    %11 = vector.broadcast %10 : vector<32x1xf32> to vector<32x128xf32>
    %12 = arith.addf %9, %11 : vector<32x128xf32>
    %c0_6 = arith.constant 0 : index
    %13 = arith.index_cast %4 : i32 to index
    %14 = vector.load %arg9[%c0_6, %13] : memref<8x256xf32, #tpu.memory_space<vmem>>, vector<8x128xf32>
    %c0_7 = arith.constant 0 : index
    %c0_8 = arith.constant 0 : index
    %15 = vector.load %arg9[%c0_7, %c0_8] : memref<8x256xf32, #tpu.memory_space<vmem>>, vector<8x256xf32>
    %cst_9 = arith.constant dense<0.000000e+00> : vector<128x256xf32>
    %16 = tpu.matmul %14, %15, %cst_9 {dimension_numbers = #tpu.dot_dimension_numbers<[0], [0], [1], [1], [0, 1, 1, 1], [], []>} : vector<8x128xf32>, vector<8x256xf32>, vector<128x256xf32> -> vector<128x256xf32>
    %cst_10 = arith.constant dense<0xFF800000> : vector<128xf32>
    %17 = vector.multi_reduction <maximumf>, %16, %cst_10 [1] : vector<128x256xf32> to vector<128xf32>
    %18 = vector.shape_cast %17 : vector<128xf32> to vector<128x1xf32>
    %19 = vector.broadcast %18 : vector<128x1xf32> to vector<128x256xf32>
    %20 = arith.subf %16, %19 : vector<128x256xf32>
    %21 = math.exp %20 : vector<128x256xf32>
    %cst_11 = arith.constant dense<0.000000e+00> : vector<128xf32>
    %22 = vector.multi_reduction <add>, %21, %cst_11 [1] : vector<128x256xf32> to vector<128xf32>
    %23 = vector.shape_cast %22 : vector<128xf32> to vector<128x1xf32>
    %24 = tpu.reciprocal %23 : vector<128x1xf32> -> vector<128x1xf32>
    %25 = vector.broadcast %24 : vector<128x1xf32> to vector<128x256xf32>
    %26 = arith.mulf %21, %25 : vector<128x256xf32>
    %c0_12 = arith.constant 0 : index
    %c0_13 = arith.constant 0 : index
    %27 = vector.load %arg11[%c0_12, %c0_13] : memref<40x128xf32, #tpu.memory_space<vmem>>, vector<32x128xf32>
    tpu.vector_store %arg11[%c0_12, %c0_13], %12 {strides = array<i32>} : memref<40x128xf32, #tpu.memory_space<vmem>>, vector<32x128xf32>,
    %c0_14 = arith.constant 0 : index
    %c0_15 = arith.constant 0 : index
    %28 = vector.load %arg10[%c0_14, %c0_15] : memref<40x256xf32, #tpu.memory_space<vmem>>, vector<40x256xf32>
    %c0_16 = arith.constant 0 : index
    %c0_17 = arith.constant 0 : index
    %29 = vector.load %arg11[%c0_16, %c0_17] : memref<40x128xf32, #tpu.memory_space<vmem>>, vector<40x128xf32>
    %cst_18 = arith.constant dense<0.000000e+00> : vector<40x256xf32>
    %30 = tpu.matmul %29, %26, %cst_18 {dimension_numbers = #tpu.dot_dimension_numbers<[1], [0], [0], [1], [0, 0, 1, 1], [], []>} : vector<40x128xf32>, vector<128x256xf32>, vector<40x256xf32> -> vector<40x256xf32>
    %31 = arith.addf %28, %30 : vector<40x256xf32>
    %c0_19 = arith.constant 0 : index
    %c0_20 = arith.constant 0 : index
    %32 = vector.load %arg10[%c0_19, %c0_20] : memref<40x256xf32, #tpu.memory_space<vmem>>, vector<40x256xf32>
    tpu.vector_store %arg10[%c0_19, %c0_20], %31 {strides = array<i32>} : memref<40x256xf32, #tpu.memory_space<vmem>>, vector<40x256xf32>,
    %c1_i32 = arith.constant 1 : i32
    %33 = arith.cmpi eq, %arg1, %c1_i32 : i32
    %34 = arith.extui %33 : i1 to i32
    %c0_i32_21 = arith.constant 0 : i32
    %35 = arith.cmpi ne, %34, %c0_i32_21 : i32
    scf.if %35 {
      %c0_22 = arith.constant 0 : index
      %c0_23 = arith.constant 0 : index
      %c0_24 = arith.constant 0 : index
      %36 = vector.load %arg2[%c0_22, %c0_23, %c0_24] : memref<1x32x256xf32, #tpu.memory_space<vmem>>, vector<1x32x256xf32>
      %37 = vector.shape_cast %36 : vector<1x32x256xf32> to vector<32x256xf32>
      %c32 = arith.constant 32 : index
      %c0_25 = arith.constant 0 : index
      %38 = vector.load %arg10[%c32, %c0_25] : memref<40x256xf32, #tpu.memory_space<vmem>>, vector<1x256xf32>
      %cst_26 = arith.constant 9.99999971E-10 : f32
      %39 = vector.broadcast %cst_26 : f32 to vector<1x256xf32>
      %40 = arith.addf %39, %38 : vector<1x256xf32>
      %41 = tpu.reciprocal %40 : vector<1x256xf32> -> vector<1x256xf32>
      %c0_27 = arith.constant 0 : index
      %c0_28 = arith.constant 0 : index
      %42 = vector.load %arg10[%c0_27, %c0_28] : memref<40x256xf32, #tpu.memory_space<vmem>>, vector<32x256xf32>
      %43 = vector.broadcast %41 : vector<1x256xf32> to vector<32x256xf32>
      %44 = arith.mulf %42, %43 : vector<32x256xf32>
      %45 = arith.subf %37, %44 : vector<32x256xf32>
      %c0_29 = arith.constant 0 : index
      %c0_30 = arith.constant 0 : index
      %46 = vector.load %arg6[%c0_29, %c0_30] : memref<32x32xf32, #tpu.memory_space<vmem>>, vector<32x32xf32>
      %cst_31 = arith.constant dense<0.000000e+00> : vector<32x256xf32>
      %47 = tpu.matmul %46, %45, %cst_31 {dimension_numbers = #tpu.dot_dimension_numbers<[1], [0], [0], [1], [0, 0, 1, 1], [], []>} : vector<32x32xf32>, vector<32x256xf32>, vector<32x256xf32> -> vector<32x256xf32>
      %c0_32 = arith.constant 0 : index
      %c0_33 = arith.constant 0 : index
      %48 = vector.load %arg7[%c0_32, %c0_33] : memref<32x1xf32, #tpu.memory_space<vmem>>, vector<32x1xf32>
      %49 = vector.broadcast %48 : vector<32x1xf32> to vector<32x256xf32>
      %50 = arith.addf %47, %49 : vector<32x256xf32>
      %cst_34 = arith.constant 0.000000e+00 : f32
      %51 = vector.broadcast %cst_34 : f32 to vector<32x256xf32>
      %52 = arith.maximumf %50, %51 : vector<32x256xf32>
      %53 = arith.addf %37, %52 : vector<32x256xf32>
      %c0_35 = arith.constant 0 : index
      %c0_36 = arith.constant 0 : index
      %c0_37 = arith.constant 0 : index
      %54 = vector.load %arg8[%c0_35, %c0_36, %c0_37] : memref<1x32x256xf32, #tpu.memory_space<vmem>>, vector<1x32x256xf32>
      %55 = vector.shape_cast %54 : vector<1x32x256xf32> to vector<32x256xf32>
      %56 = vector.shape_cast %53 : vector<32x256xf32> to vector<1x32x256xf32>
      tpu.vector_store %arg8[%c0_35, %c0_36, %c0_37], %56 {strides = array<i32>} : memref<1x32x256xf32, #tpu.memory_space<vmem>>, vector<1x32x256xf32>,
    } else {
    }
    return
  }
  func.func @transform_0(%arg0: i32, %arg1: i32) -> (i32, i32, i32) {
    %c0_i32 = arith.constant 0 : i32
    %c0_i32_0 = arith.constant 0 : i32
    %c0_i32_1 = arith.constant 0 : i32
    return %arg0, %c0_i32, %c0_i32_0 : i32, i32, i32
  }
  func.func @transform_1(%arg0: i32, %arg1: i32) -> (i32, i32) {
    %c0_i32 = arith.constant 0 : i32
    %c0_i32_0 = arith.constant 0 : i32
    %c0_i32_1 = arith.constant 0 : i32
    return %c0_i32, %c0_i32_0 : i32, i32
  }
  func.func @transform_2(%arg0: i32, %arg1: i32) -> (i32, i32) {
    %c0_i32 = arith.constant 0 : i32
    %c0_i32_0 = arith.constant 0 : i32
    %c0_i32_1 = arith.constant 0 : i32
    return %c0_i32, %c0_i32_0 : i32, i32
  }
  func.func @transform_3(%arg0: i32, %arg1: i32) -> (i32, i32) {
    %c0_i32 = arith.constant 0 : i32
    %c0_i32_0 = arith.constant 0 : i32
    %c0_i32_1 = arith.constant 0 : i32
    return %c0_i32, %c0_i32_0 : i32, i32
  }
  func.func @transform_4(%arg0: i32, %arg1: i32) -> (i32, i32) {
    %c0_i32 = arith.constant 0 : i32
    %c0_i32_0 = arith.constant 0 : i32
    %c0_i32_1 = arith.constant 0 : i32
    return %c0_i32, %c0_i32_0 : i32, i32
  }
  func.func @transform_5(%arg0: i32, %arg1: i32) -> (i32, i32) {
    %c0_i32 = arith.constant 0 : i32
    %c0_i32_0 = arith.constant 0 : i32
    %c0_i32_1 = arith.constant 0 : i32
    return %c0_i32, %c0_i32_0 : i32, i32
  }
  func.func @transform_6(%arg0: i32, %arg1: i32) -> (i32, i32, i32) {
    %c0_i32 = arith.constant 0 : i32
    %c0_i32_0 = arith.constant 0 : i32
    %c0_i32_1 = arith.constant 0 : i32
    return %arg0, %c0_i32, %c0_i32_0 : i32, i32, i32
  }
}

</mosaic_0001>

<bundles_post_ra>
// kernel: tpu_custom_call.1
= control target key start
LH: loop header
LB: loop body
LE: loop exit
PB: predicated region body
PF: predicated region fallthrough
CT: control target
= control target key end

     0   :  { %s3029_s0 = inlined_call_operand.hbm [shape: f32[2,32,256], index: 0, kind: input, shape index: {}]   ;;  %s3030_s1 = inlined_call_operand.hbm [shape: f32[8,32], index: 1, kind: input, shape index: {}]   ;;  %s3031_s2 = inlined_call_operand.hbm [shape: f32[32,32], index: 2, kind: input, shape index: {}]   ;;  %s3032_s3 = inlined_call_operand.hbm [shape: f32[32,1], index: 3, kind: input, shape index: {}]   ;;  %s3033_s4 = inlined_call_operand.hbm [shape: f32[32,32], index: 4, kind: input, shape index: {}]   ;;  %s3034_s5 = inlined_call_operand.hbm [shape: f32[32,1], index: 5, kind: input, shape index: {}]   ;;  %s3035_s6 = inlined_call_operand.hbm [shape: f32[2,32,256], index: 6, kind: output, shape index: {}]  }
   0x1   :  { %3042 = sst [smem:[#allocation22_spill]] %s3030_s1 }
   0x2   :  { %3043 = sst [smem:[#allocation23_spill]] %s3032_s3 }
   0x3   :  { %3044 = sst [smem:[#allocation24_spill]] %s3035_s6 }
   0x4   :  { %11 = vsyncpa [#allocation6], 0 }
   0x5   :  { %13 = vsyncpa [#allocation6 + $0x1], 0 }
   0x6   :  { %14 = vsyncpa [#allocation9], 0 }
   0x7   :  { %15 = vsyncpa [#allocation12], 0 }
   0x8   :  { %16 = vsyncpa [#allocation15], 0 }
   0x9   :  { %17 = vsyncpa [#allocation7], 0 }
   0xa   :  { %19 = vsyncpa [#allocation7 + $0x1], 0  ;;  %s2300_s21 = smov 0   ;;  %s2302_s22 = smov 0  }
   0xb   :  { %s2304_s23 = smov 0   ;;  %s2306_s24 = smov 0  }
   0xc   :  { %s2308_s25 = smov 0   ;;  %s2310_s26 = smov 0  }
   0xd   :  { %s2312_s27 = smov 0   ;;  %s2314_s28 = smov 0  }
   0xe LB: > { %s3039_s29 = sadd.s32 4294967295, %s2245_s28   ;;  %p1586_p0 = scmp.ge.s32.totalorder %s2245_s28, 1  ;;  %s2245_s28 = sphi %s2314_s28, %s25_s28   ;;  %s2241_s27 = sphi %s2312_s27, %s3069_s27   ;;  %s2237_s26 = sphi %s2310_s26, %s3068_s26   ;;  %s2233_s25 = sphi %s2308_s25, %s3067_s25   ;;  %s2229_s24 = sphi %s2306_s24, %s3066_s24   ;;  %s2225_s23 = sphi %s2304_s23, %s3065_s23   ;;  %s2221_s22 = sphi %s2302_s22, %s3064_s22   ;;  %s2217_s21 = sphi %s2300_s21, %s3063_s21  }
   0xf   : > { %p2344_p1 = scmp.eq.s32.totalorder %s3039_s29, 0  ;;  %p199_p2 = scmp.lt.s32.totalorder %s2245_s28, 5 }
  0x10   : > { %s2247_s8 = smov [#allocation8]   ;;  %s2248_s11 = smov [#allocation11]  }
  0x11   : > { %s3045_s30 = scalar_select %p2344_p1, 1, 0 }
  0x12   : > { %p2349_p3 = pnand %p1586_p0, %p199_p2  ;;  %s212_s9 = sshll.u32 %s2247_s8, 4  ;;  %s213_s9 = int_to_ptr.vmem [resolvable:$true] %s212_s9 }
  0x13   : > { %s235_s12 = sshll.u32 %s2248_s11, 4  ;;  %s2249_s13 = smov [#allocation10]   ;;  %s2361_s12 = int_to_ptr.vmem [resolvable:$true] %s235_s12 }
  0x14   : > { %s3046_s7 = scalar_select %p2349_p3, 1, 0 }
  0x15   : > { %p1747_p4 = pneg %p2349_p3  ;;  %s2363_s14 = sshll.u32 %s2249_s13, 4  ;;  %s223_s14 = int_to_ptr.vmem [resolvable:$true] %s2363_s14 }
  0x16   : > { %s3048_s1 = sld [smem:[#allocation22_spill]] }
  0x17   : > { %p2357_p5 = pnand %p1747_p4, %p2344_p1 }
  0x19   : > { %p2373_p7 = pneg %p2357_p5 }
  0x1c   : > { %s1965_s17 = scalar_lea.hbm %s3048_s1, 128 }
  0x1d   : > { %p1966_p6 = scmp.ne.s32.totalorder %s3048_s1, %s1965_s17  ;;  %p1972_p10 = scmp.lt.u32.totalorder %s1965_s17, %s3048_s1 }
  0x1f   : > { %p1968_p8 = pnand %p2373_p7, %p1966_p6 }
  0x21   : > { %p1969_p9 = pneg %p1968_p8 }
  0x23   : > { %p1974_p11 = pnand %p1972_p10, %p1969_p9 }
  0x25   : > { %1977 = shalt.err (!%p1974_p11)
}
  0x26   : > { %s1978_s13 = scalar_lea.vmem %s213_s9, 128  ;;  %p1986_p2 = scmp.lt.s32.totalorder %s213_s9, %s213_s9 }
  0x27   : > { %p1979_p12 = scmp.ne.s32.totalorder %s213_s9, %s1978_s13  ;;  %p1987_p4 = scmp.lt.s32.totalorder %s1978_s13, %s1978_s13 }
  0x29   : > { %p1981_p13 = pnand %p1979_p12, %p2373_p7  ;;  %p1988_p3 = por %p1987_p4, %p1986_p2 }
  0x2b   : > { %p1982_p0 = pneg %p1981_p13 }
  0x2d   : > { %p1989_p1 = pnand %p1988_p3, %p1982_p0 }
  0x2f   : > { %1992 = shalt.err (!%p1989_p1)
}
  0x30   : > { %1750 = dma.hbm_to_vmem [thread:$0]  (!%p2357_p5), %s3048_s1, 128, %s213_s9, [#allocation9]  }
  0x31   : > { %s3050_s3 = sld [smem:[#allocation23_spill]] }
  0x37   : > { %s1993_s19 = scalar_lea.hbm %s3050_s3, 512 }
  0x38   : > { %p1994_p6 = scmp.ne.s32.totalorder %s3050_s3, %s1993_s19  ;;  %p2000_p1 = scmp.lt.u32.totalorder %s1993_s19, %s3050_s3 }
  0x3a   : > { %p1996_p8 = pnand %p1994_p6, %p2373_p7 }
  0x3c   : > { %p1997_p9 = pneg %p1996_p8 }
  0x3e   : > { %p2002_p3 = pnand %p2000_p1, %p1997_p9 }
  0x40   : > { %2005 = shalt.err (!%p2002_p3)
}
  0x41   : > { %s2006_s9 = scalar_lea.vmem %s2361_s12, 512  ;;  %p2014_p13 = scmp.lt.s32.totalorder %s2361_s12, %s2361_s12 }
  0x42   : > { %p2007_p10 = scmp.ne.s32.totalorder %s2361_s12, %s2006_s9  ;;  %p2015_p0 = scmp.lt.s32.totalorder %s2006_s9, %s2006_s9 }
  0x44   : > { %p2009_p11 = pnand %p2007_p10, %p2373_p7  ;;  %p2016_p2 = por %p2015_p0, %p2014_p13 }
  0x46   : > { %p2010_p12 = pneg %p2009_p11 }
  0x48   : > { %p2017_p4 = pnand %p2016_p2, %p2010_p12 }
  0x4a   : > { %2020 = shalt.err (!%p2017_p4)
}
  0x4b   : > { %s2250_s15 = smov 128   ;;  %s2251_s29 = smov 8  }
  0x4c   : > { %1756 = dma.hbm_to_vmem [thread:$0]  (!%p2357_p5), %s3050_s3, 512, %s2361_s12, [#allocation12], %s2250_s15, %s2250_s15, %s2251_s29  }
  0x4d   : > { %s2021_s8 = scalar_lea.hbm %s3031_s2, 512 }
  0x4e   : > { %p2022_p6 = scmp.ne.s32.totalorder %s3031_s2, %s2021_s8  ;;  %p2028_p1 = scmp.lt.u32.totalorder %s2021_s8, %s3031_s2 }
  0x50   : > { %p2024_p8 = pnand %p2022_p6, %p2373_p7 }
  0x52   : > { %p2025_p9 = pneg %p2024_p8 }
  0x54   : > { %p2030_p3 = pnand %p2028_p1, %p2025_p9 }
  0x56   : > { %2033 = shalt.err (!%p2030_p3)
}
  0x57   : > { %s2034_s16 = scalar_lea.vmem %s223_s14, 512  ;;  %p2042_p13 = scmp.lt.s32.totalorder %s223_s14, %s223_s14 }
  0x58   : > { %p2035_p10 = scmp.ne.s32.totalorder %s223_s14, %s2034_s16  ;;  %p2043_p0 = scmp.lt.s32.totalorder %s2034_s16, %s2034_s16 }
  0x5a   : > { %p2037_p11 = pnand %p2035_p10, %p2373_p7  ;;  %p2044_p2 = por %p2043_p0, %p2042_p13 }
  0x5c   : > { %p2038_p12 = pneg %p2037_p11 }
  0x5e   : > { %p2045_p4 = pnand %p2044_p2, %p2038_p12 }
  0x60   : > { %2048 = shalt.err (!%p2045_p4)
}
  0x61   : > { %1753 = dma.hbm_to_vmem [thread:$0]  (!%p2357_p5), %s3031_s2, 512, %s223_s14, [#allocation9], %s2250_s15, %s2250_s15, %s2251_s29  }
  0x62   : > { %s2252_s17 = smov [#allocation13]   ;;  %s2253_s19 = smov [#allocation14]  }
  0x63   : > { %s248_s18 = sshll.u32 %s2252_s17, 4  ;;  %s261_s8 = sshll.u32 %s2253_s19, 4  ;;  %s249_s18 = int_to_ptr.vmem [resolvable:$true] %s248_s18  ;;  %s262_s8 = int_to_ptr.vmem [resolvable:$true] %s261_s8 }
  0x64   : > { %s2049_s9 = scalar_lea.hbm %s3033_s4, 512 }
  0x65   : > { %p2050_p6 = scmp.ne.s32.totalorder %s3033_s4, %s2049_s9  ;;  %p2056_p1 = scmp.lt.u32.totalorder %s2049_s9, %s3033_s4 }
  0x67   : > { %p2052_p8 = pnand %p2050_p6, %p2373_p7 }
  0x69   : > { %p2053_p9 = pneg %p2052_p8 }
  0x6b   : > { %p2058_p3 = pnand %p2056_p1, %p2053_p9 }
  0x6d   : > { %2061 = shalt.err (!%p2058_p3)
}
  0x6e   : > { %s2062_s14 = scalar_lea.vmem %s249_s18, 512  ;;  %p2070_p13 = scmp.lt.s32.totalorder %s249_s18, %s249_s18 }
  0x6f   : > { %p2063_p10 = scmp.ne.s32.totalorder %s249_s18, %s2062_s14  ;;  %p2071_p0 = scmp.lt.s32.totalorder %s2062_s14, %s2062_s14 }
  0x71   : > { %p2065_p11 = pnand %p2063_p10, %p2373_p7  ;;  %p2072_p2 = por %p2071_p0, %p2070_p13 }
  0x73   : > { %p2066_p12 = pneg %p2065_p11 }
  0x75   : > { %p2073_p4 = pnand %p2072_p2, %p2066_p12 }
  0x77   : > { %2076 = shalt.err (!%p2073_p4)
}
  0x78   : > { %1759 = dma.hbm_to_vmem [thread:$0]  (!%p2357_p5), %s3033_s4, 512, %s249_s18, [#allocation12], %s2250_s15, %s2250_s15, %s2251_s29  }
  0x79   : > { %s2077_s19 = scalar_lea.hbm %s3034_s5, 512 }
  0x7a   : > { %p2078_p6 = scmp.ne.s32.totalorder %s3034_s5, %s2077_s19  ;;  %p2084_p1 = scmp.lt.u32.totalorder %s2077_s19, %s3034_s5 }
  0x7c   : > { %p2080_p8 = pnand %p2078_p6, %p2373_p7 }
  0x7e   : > { %p2081_p9 = pneg %p2080_p8 }
  0x80   : > { %p2086_p3 = pnand %p2084_p1, %p2081_p9 }
  0x82   : > { %2089 = shalt.err (!%p2086_p3)
}
  0x83   : > { %s2090_s1 = scalar_lea.vmem %s262_s8, 512  ;;  %p2098_p13 = scmp.lt.s32.totalorder %s262_s8, %s262_s8 }
  0x84   : > { %p2091_p10 = scmp.ne.s32.totalorder %s262_s8, %s2090_s1  ;;  %p2099_p0 = scmp.lt.s32.totalorder %s2090_s1, %s2090_s1 }
  0x86   : > { %p2093_p11 = pnand %p2091_p10, %p2373_p7  ;;  %p2100_p2 = por %p2099_p0, %p2098_p13 }
  0x88   : > { %p2094_p12 = pneg %p2093_p11 }
  0x8a   : > { %p2101_p4 = pnand %p2100_p2, %p2094_p12 }
  0x8c   : > { %2104 = shalt.err (!%p2101_p4)
}
  0x8d   : > { %1762 = dma.hbm_to_vmem [thread:$0]  (!%p2357_p5), %s3034_s5, 512, %s262_s8, [#allocation15], %s2250_s15, %s2250_s15, %s2251_s29  }
  0x8e   : > { %s1585_s10 = sadd.s32 4294967294, %s2245_s28   ;;  %s34_s20 = sadd.s32 1, %s2237_s26 }
  0x8f   : > { %s37_s3 = sadd.s32 1, %s2241_s27  ;;  %p35_p7 = scmp.ge.s32.totalorder %s34_s20, 2 }
  0x90   : > { %s44_s6 = sadd.s32 1, %s2225_s23  ;;  %p51_p6 = scmp.ne.s32.totalorder %s2225_s23, %s2221_s22 }
  0x91   : > { %p52_p8 = scmp.eq.s32.totalorder %s2245_s28, 0  ;;  %s3071_s20 = smov (%p35_p7, %s34_s20), 0 }
  0x92   : > { %s3073_s3 = smov (!%p35_p7, %s37_s3), %s2241_s27  ;;  %p57_p5 = scmp.ne.s32.totalorder %s2221_s22, %s2217_s21 }
  0x93   : > { %p2489_p9 = por %p52_p8, %p51_p6  ;;  %p39_p1 = scmp.ge.s32.totalorder %s3073_s3, 2 }
  0x94   : > { %s3052_s15 = sadd.s32 4294967295, %s2245_s28   ;;  %p3053_p10 = scmp.ne.s32.totalorder %s3045_s30, 0 }
  0x95   : > { %p186_p3 = scmp.eq.s32.totalorder %s3052_s15, 3  ;;  %p192_p12 = scmp.eq.s32.totalorder %s1585_s10, 3 }
  0x96   : > { %p2499_p11 = por %p3053_p10, %p57_p5  ;;  %s3075_s3 = smov (%p39_p1, %s3073_s3), 0 }
  0x97   : > { %p2505_p13 = por %p186_p3, %p51_p6  ;;  %p2509_p0 = por %p192_p12, %p57_p5 }
  0x98   : > { %s41_s19 = ssub.s32 %s2241_s27, %s3075_s3  ;;  %p1776_p2 = scmp.lt.s32.totalorder %s2245_s28, 4 }
  0x99   : > { %s3055_s8 = scalar_select %p2505_p13, 1, 0 }
  0x9a   : > { %s3056_s17 = scalar_select %p2509_p0, 1, 0 }
  0x9b   : > { %p42_p4 = scmp.eq.s32.totalorder %s41_s19, 0  ;;  %s275_s11 = sand.u32 1, %s2225_s23  }
  0x9c   : > { %s1593_s13 = sshll.u32 %s275_s11, 6  ;;  %s1639_s16 = sshll.u32 %s2241_s27, 10 }
  0x9d   : > { %s2518_s9 = scalar_select %p42_p4, %s2225_s23, %s44_s6  }
  0x9e   : > { %s2524_s14 = scalar_lea.hbm %s3029_s0, %s1639_s16  ;;  %s279_s10 = scalar_lea.vmem [#allocation5], %s1593_s13 }
  0x9f   : > { %s286_s15 = sshll.u32 %s279_s10, 4  ;;  %p2530_p7 = pnand %p1776_p2, %p2489_p9  ;;  %s2526_s15 = int_to_ptr.vmem [resolvable:$true] %s286_s15 }
  0xa0   : > { %s2534_s6 = scalar_lea.sflag [#allocation6], %s275_s11  ;;  %s2105_s1 = scalar_lea.hbm %s2524_s14, 1024 }
  0xa1   : > { %p2106_p6 = scmp.ne.s32.totalorder %s2524_s14, %s2105_s1  ;;  %p2107_p8 = pneg %p2530_p7 }
  0xa2   : > { %s2110_s12 = scalar_lea.hbm %s3029_s0, 2048  ;;  %p2111_p9 = scmp.lt.u32.totalorder %s2524_s14, %s3029_s0 }
  0xa3   : > { %p2108_p5 = pnand %p2107_p8, %p2106_p6  ;;  %p2112_p3 = scmp.lt.u32.totalorder %s2110_s12, %s2105_s1 }
  0xa4   : > { %p2114_p12 = scmp.lt.u32.totalorder %s2105_s1, %s2524_s14 }
  0xa5   : > { %p2109_p1 = pneg %p2108_p5  ;;  %p2113_p10 = por %p2112_p3, %p2111_p9 }
  0xa7   : > { %p2115_p2 = por %p2114_p12, %p2113_p10 }
  0xa9   : > { %p2116_p4 = pnand %p2115_p2, %p2109_p1 }
  0xab   : > { %2119 = shalt.err (!%p2116_p4)
}
  0xac   : > { %s2120_s11 = scalar_lea.vmem %s2526_s15, 1024  ;;  %s2254_s13 = smov [#allocation5]  }
  0xad   : > { %p2121_p6 = scmp.ne.s32.totalorder %s2526_s15, %s2120_s11  ;;  %s2125_s16 = sshll.u32 %s2254_s13, 4  ;;  %s2126_s16 = int_to_ptr.vmem [resolvable:$false] %s2125_s16 }
  0xae   : > { %s2127_s18 = scalar_lea.vmem %s2126_s16, 2048  ;;  %p2128_p13 = scmp.lt.s32.totalorder %s2526_s15, %s2126_s16 }
  0xaf   : > { %p2123_p5 = pnand %p2121_p6, %p2107_p8  ;;  %p2129_p9 = scmp.lt.s32.totalorder %s2127_s18, %s2120_s11 }
  0xb1   : > { %p2124_p0 = pneg %p2123_p5  ;;  %p2130_p3 = por %p2129_p9, %p2128_p13 }
  0xb3   : > { %p2131_p10 = pnand %p2130_p3, %p2124_p0 }
  0xb5   : > { %2134 = shalt.err (!%p2131_p10)
}
  0xb6   : > { %s2255_s1 = smov 256   ;;  %s2256_s12 = smov 16  }
  0xb7   : > { %1766 = dma.hbm_to_vmem [thread:$0]  (!%p2530_p7), %s2524_s14, 1024, %s2526_s15, %s2534_s6, %s2255_s1, %s2255_s1, %s2256_s12  }
  0xb8   : > { %p3058_p8 = scmp.ne.s32.totalorder %s3046_s7, 0 }
  0xb9   : > { %s2565_s10 = sand.u32 (!%p3058_p8), 1, %s2221_s22  }
  0xba   : > { %298 = sbr.rel (%p3058_p8) target bundleno = 1678 (0x68e), region = 44  ;;  %s1597_s11 = sshll.u32 (!%p3058_p8), %s2565_s10, 6 }
  0xbb   : > { %s301_s13 = scalar_lea.sflag (!%p3058_p8), [#allocation6], %s2565_s10  ;;  %s2569_s16 = scalar_lea.vmem (!%p3058_p8), [#allocation5], %s1597_s11 }
  0xc1   : > { %2196 = dma.done.wait (%p2499_p11), %s301_s13, 1024  }
  0xc2   : > { %2198 = vsyncadd (%p2499_p11), %s301_s13, 4294966272  ;;  %p3059_p13 = scmp.ne.s32.totalorder %s3045_s30, 0 }
  0xc4   : > { %2200 = dma.done.wait (%p3059_p13), [#allocation9], 640  }
  0xc5   : > { %2202 = vsyncadd (%p3059_p13), [#allocation9], 4294966656 }
  0xc6   : > { %2204 = dma.done.wait (%p3059_p13), [#allocation12], 1024  }
  0xc7   : > { %2206 = vsyncadd (%p3059_p13), [#allocation12], 4294966272 }
  0xc8   : > { %2208 = dma.done.wait (%p3059_p13), [#allocation15], 512  }
  0xc9   : > { %2210 = vsyncadd (%p3059_p13), [#allocation15], 4294966784  ;;  %s2587_s7 = scalar_lea.vmem [#allocation16], %s1597_s11  ;;  %p1604_p11 = scmp.ne.s32.totalorder %s2229_s24, 0 }
  0xca   : > { %v359_v0 = vld [vmem:[%s2569_s16 + $0x8] sm:$0xff] (!%p1604_p11)  ;;  %v361_v1 = vld [vmem:[%s2569_s16 + $0x18] sm:$0xff] (!%p1604_p11)  ;;  %v358_v2 = vld [vmem:[%s2569_s16] sm:$0xff] (!%p1604_p11)  ;;  %v453_v3 = vlaneseq (!%p1604_p11)  ;;  %v2257_v8 = vmov (!%p1604_p11), 0.0   ;;  %vm366_vm1 = vcmask (!%p1604_p11), 261120  }
  0xcb   : > { %356 = sbr.rel (%p1604_p11) target bundleno = 427 (0x1ab), region = 72  ;;  %v1663_v4 = vpack.c.bf16 (!%p1604_p11), %v361_v1, %v359_v0  ;;  %v360_v5 = vld [vmem:[%s2569_s16 + $0x10] sm:$0xff] (!%p1604_p11)  ;;  %v363_v6 = vld [vmem:[%s2569_s16 + $0x28] sm:$0xff] (!%p1604_p11)  ;;  %v365_v7 = vld [vmem:[%s2569_s16 + $0x38] sm:$0xff] (!%p1604_p11)  ;;  %434 = vmatprep.mubr.f32.mxu0 (!%p1604_p11), %v2257_v8  ;;  %443 = vst [vmem:[#allocation3] sm:$0xff] (!%p1604_p11), %v2257_v8 }
  0xcc   : > { %444 = vst [vmem:[#allocation3 + $0x8] sm:$0xff] (!%p1604_p11), %v2257_v8  ;;  %445 = vst [vmem:[#allocation3 + $0x10] sm:$0xff] (!%p1604_p11), %v2257_v8  ;;  %v1665_v9 = vpack.c.bf16 (!%p1604_p11), %v360_v5, %v358_v2  ;;  %v1667_v10 = vpack.c.bf16 (!%p1604_p11), %v365_v7, %v363_v6  ;;  %v362_v11 = vld [vmem:[%s2569_s16 + $0x20] sm:$0xff] (!%p1604_p11)  ;;  %v364_v12 = vld [vmem:[%s2569_s16 + $0x30] sm:$0xff] (!%p1604_p11)  ;;  %v454_v13 = vshrl.u32 (!%p1604_p11), %v453_v3, 7 }
  0xcd   : > { %446 = vst [vmem:[#allocation3 + $0x18] sm:$0xff] (!%p1604_p11), %v2257_v8  ;;  %447 = vst [vmem:[#allocation3 + $0x20] sm:$0xff] (!%p1604_p11), %v2257_v8  ;;  %1664 = vmatprep.subr.bf16.mxu0 (!%p1604_p11), %v1663_v4  ;;  %v1669_v14 = vpack.c.bf16 (!%p1604_p11), %v364_v12, %v362_v11  ;;  %v357_v17 = vld [vmem:[#allocation8] sm:$0xff] (!%p1604_p11) }
  0xce   : > { %448 = vst [vmem:[#allocation3 + $0x28] sm:$0xff] (!%p1604_p11), %v2257_v8  ;;  %449 = vst [vmem:[#allocation3 + $0x30] sm:$0xff] (!%p1604_p11), %v2257_v8  ;;  %1666 = vmatpush1.bf16.msra.mxu0 (!%p1604_p11), %v1665_v9  ;;  %v458_v15 = vadd.s32 (!%p1604_p11), 32, %v454_v13 }
  0xcf   : > { %450 = vst [vmem:[#allocation3 + $0x38] sm:$0xff] (!%p1604_p11), %v2257_v8  ;;  %451 = vst [vmem:[#allocation3 + $0x40] sm:$0xff] (!%p1604_p11), %v2257_v8  ;;  %1668 = vmatprep.subr.bf16.mxu0 (!%p1604_p11), %v1667_v10 }
  0xd0   : > { %452 = vst [vmem:[#allocation3 + $0x48] sm:$0xff] (!%p1604_p11), %v2257_v8  ;;  %vm463_vm0 = vcmp.eq.s32.totalorder (!%p1604_p11), %v458_v15, 32 }
  0xd1   : > { %v468_v16 = vsel (!%p1604_p11), %vm463_vm0, 1.0, %v2257_v8 }
  0xd2   : > { %1670 = vmatpush1.bf16.msra.mxu0 %v1669_v14  ;;  %473 = vst [vmem:[#allocation4 + $0x20] sm:$0xff] %v468_v16 }
  0xd5   : > { %1605 = vmatmul.mubr.msk.f32.vlgmr.msra.gmra.mrb[0].mxu0 %vm366_vm1, %v357_v17 }
 0x1a8   : > { %v436_v18 = vpop.f32.mrb[0].mxu0 }
 0x1a9   : > { %441 = vst [vmem:[#allocation2] sm:$0xff] %v436_v18  ;;  %v438_v19 = vpop.f32.mrb[1].mxu0 }
 0x1aa   : > { %442 = vst [vmem:[#allocation2 + $0x8] sm:$0xff] %v438_v19 }
 0x1ab PF: > { %s1606_s30 = sshll.u32 %s2229_s24, 7  ;;  %v2258_v22 = vmov 0.0   ;;  %vm646_vm2 = vcmask 64512   ;;  %v483_v46 = vld [vmem:[#allocation10] sm:$0xff]  ;;  %vm511_vm3 = vcmask 261120   ;;  %v484_v47 = vld [vmem:[#allocation10 + $0x8] sm:$0xff] }
 0x1ac   : > { %s2599_s29 = sshra.s32 %s1606_s30, 7  ;;  %759 = vmatprep.mubr.f32.mxu1 %v2258_v22  ;;  %1657 = vmatprep.mubr.msk.f32.mxu0 %vm511_vm3, %v483_v46  ;;  %v2259_v48 = vmov 0   ;;  %v485_v3 = vld [vmem:[#allocation10 + $0x10] sm:$0xff]  ;;  %v486_v5 = vld [vmem:[#allocation10 + $0x18] sm:$0xff]  ;;  %p1629_p0 = scmp.ne.s32.totalorder %s2229_s24, 1 }
 0x1ad   : > { %s1607_s14 = sshll.u32 %s2599_s29, 3  ;;  %1863 = vset.pattern.permute.xlu1 %v2259_v48 }
 0x1ae   : > { %s610_s15 = scalar_lea.vmem [#allocation2], %s1607_s14  ;;  %s478_s19 = scalar_lea.vmem %s2569_s16, %s1607_s14 [#allocation5] }
 0x1af   : > { %v479_v40 = vld [vmem:[%s478_s19] sm:$0xff]  ;;  %v480_v41 = vld [vmem:[%s478_s19 + $0x10] sm:$0xff] }
 0x1b0   : > { %v612_v21 = vld [vmem:[#allocation2] sm:$0xff]  ;;  %v1671_v42 = vpack.c.bf16 %v480_v41, %v479_v40  ;;  %v482_v44 = vld [vmem:[%s478_s19 + $0x30] sm:$0xff] }
 0x1b1   : > { %v613_v20 = vld [vmem:[#allocation2 + $0x8] sm:$0xff]  ;;  %v611_v23 = vld [vmem:[%s610_s15] sm:$0xff] }
 0x1b2   : > { %695 = vmatprep.subr.mxu1 %v613_v20  ;;  %614 = vxpose.xlu0.b32.start.end [1/1] (short) %v611_v23, 128  ;;  %v481_v43 = vld [vmem:[%s478_s19 + $0x20] sm:$0xff] }
 0x1b3   : > { %696 = vmatpush1.msra.mxu1 %v612_v21  ;;  %1672 = vmatprep.subr.bf16.mxu0 %v1671_v42  ;;  %v1675_v45 = vpack.c.bf16 %v482_v44, %v481_v43 }
 0x1b4   : > { %1674 = vmatpush3.bf16.msra.mxu0 %v1671_v42 }
 0x1b5   : > { %1676 = vmatprep.subr.bf16.mxu0 %v1675_v45 }
 0x1b8   : > { %1678 = vmatpush3.bf16.msra.mxu0 %v1675_v45 }
 0x1bb   : > { %1658 = vmatmul.mubr.msk.f32.vlgmr.msra.gmra.mrb[0].mxu0 %vm511_vm3, %v484_v47 }
 0x1bc   : > { %1660 = vmatprep.mubr.msk.f32.mxu0 %vm511_vm3, %v485_v3 }
 0x1bf   : > { %1661 = vmatmul.mubr.msk.f32.gmra.mrb[2].mxu0 %vm511_vm3, %v486_v5 }
 0x1c0   : > { %1179 = vmatprep.mubr.f32.mxu0 %v2258_v22 }
 0x1db   : > { %1864 = vset.pattern.permute.xlu0 %v2259_v48 }
 0x232   : > { %v630_v24 = vpop.trf.xlu0 }
 0x233   : > { %1613 = vmatmul.mubr.msk.f32.vlgmr.msra.gmra.mrb[0].mxu1 %vm646_vm2, %v630_v24 }
 0x234   : > { %765 = vmatprep.mubr.f32.mxu1 %v2258_v22 }
 0x236   : > { %v631_v25 = vpop.trf.xlu0 }
 0x237   : > { %1614 = vmatmul.mubr.msk.f32.gmra.mrb[2].mxu1 %vm646_vm2, %v631_v25 }
 0x238   : > { %771 = vmatprep.mubr.f32.mxu1 %v2258_v22 }
 0x23a   : > { %v632_v26 = vpop.trf.xlu0 }
 0x23b   : > { %1615 = vmatmul.mubr.msk.f32.gmra.mrb[4].mxu1 %vm646_vm2, %v632_v26 }
 0x23c   : > { %777 = vmatprep.mubr.f32.mxu1 %v2258_v22 }
 0x23e   : > { %v633_v27 = vpop.trf.xlu0 }
 0x23f   : > { %1616 = vmatmul.mubr.msk.f32.gmra.mrb[6].mxu1 %vm646_vm2, %v633_v27 }
 0x240   : > { %783 = vmatprep.mubr.f32.mxu1 %v2258_v22 }
 0x242   : > { %v634_v28 = vpop.trf.xlu0 }
 0x243   : > { %1617 = vmatmul.mubr.msk.f32.gmra.mrb[8].mxu1 %vm646_vm2, %v634_v28 }
 0x244   : > { %789 = vmatprep.mubr.f32.mxu1 %v2258_v22 }
 0x246   : > { %v635_v29 = vpop.trf.xlu0 }
 0x247   : > { %1618 = vmatmul.mubr.msk.f32.gmra.mrb[10].mxu1 %vm646_vm2, %v635_v29 }
 0x248   : > { %795 = vmatprep.mubr.f32.mxu1 %v2258_v22 }
 0x24a   : > { %v636_v30 = vpop.trf.xlu0 }
 0x24b   : > { %1619 = vmatmul.mubr.msk.f32.gmra.mrb[12].mxu1 %vm646_vm2, %v636_v30 }
 0x24c   : > { %801 = vmatprep.mubr.f32.mxu1 %v2258_v22 }
 0x24e   : > { %v637_v31 = vpop.trf.xlu0 }
 0x24f   : > { %1620 = vmatmul.mubr.msk.f32.gmra.mrb[14].mxu1 %vm646_vm2, %v637_v31 }
 0x250   : > { %807 = vmatprep.mubr.f32.mxu1 %v2258_v22 }
 0x252   : > { %v638_v32 = vpop.trf.xlu0 }
 0x253   : > { %1621 = vmatmul.mubr.msk.f32.gmra.mrb[16].mxu1 %vm646_vm2, %v638_v32 }
 0x254   : > { %813 = vmatprep.mubr.f32.mxu1 %v2258_v22 }
 0x256   : > { %v639_v33 = vpop.trf.xlu0 }
 0x257   : > { %1622 = vmatmul.mubr.msk.f32.gmra.mrb[18].mxu1 %vm646_vm2, %v639_v33 }
 0x258   : > { %819 = vmatprep.mubr.f32.mxu1 %v2258_v22 }
 0x25a   : > { %v640_v34 = vpop.trf.xlu0 }
 0x25b   : > { %1623 = vmatmul.mubr.msk.f32.gmra.mrb[20].mxu1 %vm646_vm2, %v640_v34 }
 0x25c   : > { %825 = vmatprep.mubr.f32.mxu1 %v2258_v22 }
 0x25e   : > { %v641_v35 = vpop.trf.xlu0 }
 0x25f   : > { %1624 = vmatmul.mubr.msk.f32.gmra.mrb[22].mxu1 %vm646_vm2, %v641_v35 }
 0x260   : > { %831 = vmatprep.mubr.f32.mxu1 %v2258_v22 }
 0x262   : > { %v642_v36 = vpop.trf.xlu0 }
 0x263   : > { %1625 = vmatmul.mubr.msk.f32.gmra.mrb[24].mxu1 %vm646_vm2, %v642_v36  ;;  %v487_v36 = vld [vmem:[#allocation11] sm:$0xff] }
 0x264   : > { %837 = vmatprep.mubr.f32.mxu1 %v2258_v22 }
 0x266   : > { %v643_v37 = vpop.trf.xlu0 }
 0x267   : > { %1626 = vmatmul.mubr.msk.f32.gmra.mrb[26].mxu1 %vm646_vm2, %v643_v37 }
 0x268   : > { %843 = vmatprep.mubr.f32.mxu1 %v2258_v22 }
 0x26a   : > { %v644_v38 = vpop.trf.xlu0 }
 0x26b   : > { %1627 = vmatmul.mubr.msk.f32.gmra.mrb[28].mxu1 %vm646_vm2, %v644_v38 }
 0x26c   : > { %849 = vmatprep.mubr.f32.mxu1 %v2258_v22 }
 0x26e   : > { %v645_v39 = vpop.trf.xlu0 }
 0x26f   : > { %1628 = vmatmul.mubr.msk.f32.gmra.mrb[30].mxu1 %vm646_vm2, %v645_v39 }
 0x28e   : > { %v2740_v37 = vpop.f32.mrb[0].mxu0 }
 0x28f   : > { %v2742_v38 = vpop.f32.mrb[1].mxu0 }
 0x306   : > { %v2641_v49 = vpop.f32.mrb[0].mxu1 }
 0x307   : > { %v2643_v50 = vpop.f32.mrb[1].mxu1 }
 0x308   : > { %v856_v51 = vmax.f32 %v2641_v49, %v2643_v50 }
 0x30a   : > { %857 = vmax.xlane.f32.xlu0 %v856_v51  ;;  %v2647_v52 = vpop.f32.mrb[2].mxu1 }
 0x30b   : > { %v2649_v53 = vpop.f32.mrb[3].mxu1 }
 0x30c   : > { %v859_v54 = vmax.f32 %v2647_v52, %v2649_v53 }
 0x30e   : > { %860 = vmax.xlane.f32.xlu1 %v859_v54  ;;  %v2653_v55 = vpop.f32.mrb[4].mxu1 }
 0x30f   : > { %v2655_v56 = vpop.f32.mrb[5].mxu1 }
 0x310   : > { %v862_v57 = vmax.f32 %v2653_v55, %v2655_v56 }
 0x312   : > { %863 = vmax.xlane.f32.xlu1 %v862_v57  ;;  %v2659_v58 = vpop.f32.mrb[6].mxu1 }
 0x313   : > { %v2661_v59 = vpop.f32.mrb[7].mxu1 }
 0x314   : > { %v865_v60 = vmax.f32 %v2659_v58, %v2661_v59 }
 0x316   : > { %866 = vmax.xlane.f32.xlu1 %v865_v60  ;;  %v2665_v61 = vpop.f32.mrb[8].mxu1 }
 0x317   : > { %v2667_v62 = vpop.f32.mrb[9].mxu1 }
 0x318   : > { %v868_v63 = vmax.f32 %v2665_v61, %v2667_v62 }
 0x31a   : > { %869 = vmax.xlane.f32.xlu1 %v868_v63  ;;  %v2671_v0 = vpop.f32.mrb[10].mxu1 }
 0x31b   : > { %v2673_v1 = vpop.f32.mrb[11].mxu1 }
 0x31c   : > { %v871_v2 = vmax.f32 %v2671_v0, %v2673_v1 }
 0x31e   : > { %872 = vmax.xlane.f32.xlu1 %v871_v2  ;;  %v2677_v4 = vpop.f32.mrb[12].mxu1 }
 0x31f   : > { %v2680_v6 = vpop.f32.mrb[13].mxu1 }
 0x320   : > { %v874_v7 = vmax.f32 %v2677_v4, %v2680_v6 }
 0x322   : > { %875 = vmax.xlane.f32.xlu1 %v874_v7  ;;  %v2686_v8 = vpop.f32.mrb[14].mxu1 }
 0x323   : > { %v2688_v9 = vpop.f32.mrb[15].mxu1 }
 0x324   : > { %v877_v10 = vmax.f32 %v2686_v8, %v2688_v9 }
 0x326   : > { %878 = vmax.xlane.f32.xlu1 %v877_v10  ;;  %v2692_v11 = vpop.f32.mrb[16].mxu1 }
 0x327   : > { %v2694_v12 = vpop.f32.mrb[17].mxu1 }
 0x328   : > { %v880_v13 = vmax.f32 %v2692_v11, %v2694_v12 }
 0x32a   : > { %881 = vmax.xlane.f32.xlu1 %v880_v13  ;;  %v2698_v14 = vpop.f32.mrb[18].mxu1 }
 0x32b   : > { %v2700_v15 = vpop.f32.mrb[19].mxu1 }
 0x32c   : > { %v883_v16 = vmax.f32 %v2698_v14, %v2700_v15 }
 0x32e   : > { %884 = vmax.xlane.f32.xlu1 %v883_v16  ;;  %v2704_v17 = vpop.f32.mrb[20].mxu1 }
 0x32f   : > { %v2706_v18 = vpop.f32.mrb[21].mxu1 }
 0x330   : > { %v886_v19 = vmax.f32 %v2704_v17, %v2706_v18 }
 0x332   : > { %887 = vmax.xlane.f32.xlu1 %v886_v19  ;;  %v2710_v20 = vpop.f32.mrb[22].mxu1 }
 0x333   : > { %v2712_v21 = vpop.f32.mrb[23].mxu1 }
 0x334   : > { %v889_v23 = vmax.f32 %v2710_v20, %v2712_v21 }
 0x336   : > { %890 = vmax.xlane.f32.xlu1 %v889_v23  ;;  %v2716_v24 = vpop.f32.mrb[24].mxu1 }
 0x337   : > { %v2718_v25 = vpop.f32.mrb[25].mxu1 }
 0x338   : > { %v892_v26 = vmax.f32 %v2716_v24, %v2718_v25 }
 0x33a   : > { %893 = vmax.xlane.f32.xlu1 %v892_v26  ;;  %v2722_v27 = vpop.f32.mrb[26].mxu1 }
 0x33b   : > { %v2724_v28 = vpop.f32.mrb[27].mxu1 }
 0x33c   : > { %v895_v29 = vmax.f32 %v2722_v27, %v2724_v28 }
 0x33e   : > { %896 = vmax.xlane.f32.xlu1 %v895_v29  ;;  %v2728_v30 = vpop.f32.mrb[28].mxu1 }
 0x33f   : > { %v2730_v31 = vpop.f32.mrb[29].mxu1 }
 0x340   : > { %v898_v32 = vmax.f32 %v2728_v30, %v2730_v31 }
 0x342   : > { %899 = vmax.xlane.f32.xlu1 %v898_v32  ;;  %v2734_v33 = vpop.f32.mrb[30].mxu1 }
 0x343   : > { %v2736_v34 = vpop.f32.mrb[31].mxu1 }
 0x344   : > { %v901_v35 = vmax.f32 %v2734_v33, %v2736_v34 }
 0x346   : > { %902 = vmax.xlane.f32.xlu1 %v901_v35 }
 0x357   : > { %493 = vperm.xlu1 %1863, %v487_v36  }
 0x397   : > { %v858_v39 = vpop.xlane.xlu0 %857 }
 0x398   : > { %v904_v40 = vsub.f32 %v2641_v49, %v858_v39  ;;  %v905_v41 = vsub.f32 %v2643_v50, %v858_v39 }
 0x39a   : > { %v936_v42 = vmul.f32 1.442695, %v904_v40  ;;  %v938_v43 = vmul.f32 1.442695, %v905_v41 }
 0x39b   : > { %v861_v44 = vpop.xlane.xlu1 %860 }
 0x39c   : > { %1865 = vpow2.f32 %v936_v42  ;;  %v906_v45 = vsub.f32 %v2647_v52, %v861_v44  ;;  %v907_v46 = vsub.f32 %v2649_v53, %v861_v44 }
 0x39d   : > { %1867 = vpow2.f32 %v938_v43 }
 0x39e   : > { %v940_v47 = vmul.f32 1.442695, %v906_v45  ;;  %v942_v48 = vmul.f32 1.442695, %v907_v46 }
 0x39f   : > { %v864_v51 = vpop.xlane.xlu1 %863 }
 0x3a0   : > { %1869 = vpow2.f32 %v940_v47  ;;  %v908_v54 = vsub.f32 %v2653_v55, %v864_v51  ;;  %v909_v57 = vsub.f32 %v2655_v56, %v864_v51 }
 0x3a1   : > { %1871 = vpow2.f32 %v942_v48 }
 0x3a2   : > { %v944_v49 = vmul.f32 1.442695, %v908_v54  ;;  %v946_v50 = vmul.f32 1.442695, %v909_v57 }
 0x3a3   : > { %v867_v60 = vpop.xlane.xlu1 %866 }
 0x3a4   : > { %1873 = vpow2.f32 %v944_v49  ;;  %v910_v63 = vsub.f32 %v2659_v58, %v867_v60  ;;  %v911_v52 = vsub.f32 %v2661_v59, %v867_v60 }
 0x3a5   : > { %1875 = vpow2.f32 %v946_v50 }
 0x3a6   : > { %v2752_v53 = vpop.eup %1865  ;;  %v948_v2 = vmul.f32 1.442695, %v910_v63  ;;  %v950_v3 = vmul.f32 1.442695, %v911_v52 }
 0x3a7   : > { %v2754_v5 = vpop.eup %1867  ;;  %v870_v7 = vpop.xlane.xlu1 %869 }
 0x3a8   : > { %1877 = vpow2.f32 %v948_v2  ;;  %v912_v55 = vsub.f32 %v2665_v61, %v870_v7  ;;  %v913_v56 = vsub.f32 %v2667_v62, %v870_v7  ;;  %v1000_v10 = vadd.f32 %v2754_v5, %v2752_v53 }
 0x3a9   : > { %1879 = vpow2.f32 %v950_v3 }
 0x3aa   : > { %v2760_v58 = vpop.eup %1869  ;;  %v952_v59 = vmul.f32 1.442695, %v912_v55  ;;  %v954_v13 = vmul.f32 1.442695, %v913_v56  ;;  %1001 = vadd.xlane.f32.xlu1 %v1000_v10 }
 0x3ab   : > { %v2762_v16 = vpop.eup %1871  ;;  %v873_v19 = vpop.xlane.xlu1 %872 }
 0x3ac   : > { %1881 = vpow2.f32 %v952_v59  ;;  %v914_v23 = vsub.f32 %v2671_v0, %v873_v19  ;;  %v915_v26 = vsub.f32 %v2673_v1, %v873_v19  ;;  %v1003_v61 = vadd.f32 %v2762_v16, %v2760_v58 }
 0x3ad   : > { %1883 = vpow2.f32 %v954_v13 }
 0x3ae   : > { %v2768_v62 = vpop.eup %1873  ;;  %v956_v29 = vmul.f32 1.442695, %v914_v23  ;;  %v958_v32 = vmul.f32 1.442695, %v915_v26  ;;  %1004 = vadd.xlane.f32.xlu1 %v1003_v61 }
 0x3af   : > { %v2770_v35 = vpop.eup %1875  ;;  %v876_v36 = vpop.xlane.xlu1 %875 }
 0x3b0   : > { %1885 = vpow2.f32 %v956_v29  ;;  %v916_v39 = vsub.f32 %v2677_v4, %v876_v36  ;;  %v917_v40 = vsub.f32 %v2680_v6, %v876_v36  ;;  %v1006_v0 = vadd.f32 %v2770_v35, %v2768_v62 }
 0x3b1   : > { %1887 = vpow2.f32 %v958_v32 }
 0x3b2   : > { %v2776_v1 = vpop.eup %1877  ;;  %v960_v41 = vmul.f32 1.442695, %v916_v39  ;;  %v962_v42 = vmul.f32 1.442695, %v917_v40  ;;  %1007 = vadd.xlane.f32.xlu1 %v1006_v0 }
 0x3b3   : > { %v2778_v43 = vpop.eup %1879  ;;  %v879_v44 = vpop.xlane.xlu1 %878 }
 0x3b4   : > { %1889 = vpow2.f32 %v960_v41  ;;  %v918_v45 = vsub.f32 %v2686_v8, %v879_v44  ;;  %v919_v46 = vsub.f32 %v2688_v9, %v879_v44  ;;  %v1009_v4 = vadd.f32 %v2778_v43, %v2776_v1 }
 0x3b5   : > { %1891 = vpow2.f32 %v962_v42 }
 0x3b6   : > { %v2784_v6 = vpop.eup %1881  ;;  %v964_v47 = vmul.f32 1.442695, %v918_v45  ;;  %v966_v48 = vmul.f32 1.442695, %v919_v46  ;;  %1010 = vadd.xlane.f32.xlu1 %v1009_v4 }
 0x3b7   : > { %v2786_v51 = vpop.eup %1883  ;;  %v882_v54 = vpop.xlane.xlu1 %881 }
 0x3b8   : > { %1893 = vpow2.f32 %v964_v47  ;;  %v920_v57 = vsub.f32 %v2692_v11, %v882_v54  ;;  %v921_v49 = vsub.f32 %v2694_v12, %v882_v54  ;;  %v1012_v8 = vadd.f32 %v2786_v51, %v2784_v6 }
 0x3b9   : > { %1895 = vpow2.f32 %v966_v48 }
 0x3ba   : > { %v2792_v9 = vpop.eup %1885  ;;  %v968_v50 = vmul.f32 1.442695, %v920_v57  ;;  %v970_v60 = vmul.f32 1.442695, %v921_v49  ;;  %1013 = vadd.xlane.f32.xlu1 %v1012_v8 }
 0x3bb   : > { %v2794_v63 = vpop.eup %1887  ;;  %v885_v52 = vpop.xlane.xlu1 %884 }
 0x3bc   : > { %1897 = vpow2.f32 %v968_v50  ;;  %v922_v2 = vsub.f32 %v2698_v14, %v885_v52  ;;  %v923_v3 = vsub.f32 %v2700_v15, %v885_v52  ;;  %v1015_v11 = vadd.f32 %v2794_v63, %v2792_v9 }
 0x3bd   : > { %1899 = vpow2.f32 %v970_v60 }
 0x3be   : > { %v2800_v12 = vpop.eup %1889  ;;  %v972_v7 = vmul.f32 1.442695, %v922_v2  ;;  %v974_v55 = vmul.f32 1.442695, %v923_v3  ;;  %1016 = vadd.xlane.f32.xlu1 %v1015_v11 }
 0x3bf   : > { %v2802_v56 = vpop.eup %1891  ;;  %v888_v10 = vpop.xlane.xlu1 %887 }
 0x3c0   : > { %1901 = vpow2.f32 %v972_v7  ;;  %v924_v59 = vsub.f32 %v2704_v17, %v888_v10  ;;  %v925_v13 = vsub.f32 %v2706_v18, %v888_v10  ;;  %v1018_v14 = vadd.f32 %v2802_v56, %v2800_v12 }
 0x3c1   : > { %1903 = vpow2.f32 %v974_v55 }
 0x3c2   : > { %v2808_v15 = vpop.eup %1893  ;;  %v976_v19 = vmul.f32 1.442695, %v924_v59  ;;  %v978_v23 = vmul.f32 1.442695, %v925_v13  ;;  %1019 = vadd.xlane.f32.xlu1 %v1018_v14 }
 0x3c3   : > { %v2810_v26 = vpop.eup %1895  ;;  %v891_v61 = vpop.xlane.xlu1 %890 }
 0x3c4   : > { %1905 = vpow2.f32 %v976_v19  ;;  %v926_v29 = vsub.f32 %v2710_v20, %v891_v61  ;;  %v927_v32 = vsub.f32 %v2712_v21, %v891_v61  ;;  %v1021_v17 = vadd.f32 %v2810_v26, %v2808_v15 }
 0x3c5   : > { %1907 = vpow2.f32 %v978_v23 }
 0x3c6   : > { %v2816_v18 = vpop.eup %1897  ;;  %v980_v36 = vmul.f32 1.442695, %v926_v29  ;;  %v982_v39 = vmul.f32 1.442695, %v927_v32  ;;  %1022 = vadd.xlane.f32.xlu1 %v1021_v17 }
 0x3c7   : > { %v2818_v40 = vpop.eup %1899  ;;  %v894_v0 = vpop.xlane.xlu1 %893 }
 0x3c8   : > { %1909 = vpow2.f32 %v980_v36  ;;  %v928_v41 = vsub.f32 %v2716_v24, %v894_v0  ;;  %v929_v42 = vsub.f32 %v2718_v25, %v894_v0  ;;  %v1024_v20 = vadd.f32 %v2818_v40, %v2816_v18  ;;  %v489_v0 = vld [vmem:[#allocation11 + $0x10] sm:$0xff] }
 0x3c9   : > { %1911 = vpow2.f32 %v982_v39 }
 0x3ca   : > { %v2824_v21 = vpop.eup %1901  ;;  %v984_v44 = vmul.f32 1.442695, %v928_v41  ;;  %v986_v45 = vmul.f32 1.442695, %v929_v42  ;;  %1025 = vadd.xlane.f32.xlu1 %v1024_v20  ;;  %v2875_v41 = vpop.f32.mrb[2].mxu0  ;;  %v490_v20 = vld [vmem:[#allocation11 + $0x18] sm:$0xff] }
 0x3cb   : > { %v2826_v46 = vpop.eup %1903  ;;  %v897_v4 = vpop.xlane.xlu1 %896 }
 0x3cc   : > { %1913 = vpow2.f32 %v984_v44  ;;  %v930_v47 = vsub.f32 %v2722_v27, %v897_v4  ;;  %v931_v48 = vsub.f32 %v2724_v28, %v897_v4  ;;  %v1027_v24 = vadd.f32 %v2826_v46, %v2824_v21  ;;  %v2877_v42 = vpop.f32.mrb[3].mxu0  ;;  %v488_v44 = vld [vmem:[#allocation11 + $0x8] sm:$0xff] }
 0x3cd   : > { %1915 = vpow2.f32 %v986_v45 }
 0x3ce   : > { %v2832_v25 = vpop.eup %1905  ;;  %v988_v54 = vmul.f32 1.442695, %v930_v47  ;;  %v990_v57 = vmul.f32 1.442695, %v931_v48  ;;  %1028 = vadd.xlane.f32.xlu1 %v1027_v24 }
 0x3cf   : > { %v2834_v49 = vpop.eup %1907  ;;  %v900_v8 = vpop.xlane.xlu1 %899 }
 0x3d0   : > { %1917 = vpow2.f32 %v988_v54  ;;  %v932_v50 = vsub.f32 %v2728_v30, %v900_v8  ;;  %v933_v60 = vsub.f32 %v2730_v31, %v900_v8  ;;  %v1030_v27 = vadd.f32 %v2834_v49, %v2832_v25 }
 0x3d1   : > { %1919 = vpow2.f32 %v990_v57 }
 0x3d2   : > { %v2840_v28 = vpop.eup %1909  ;;  %v992_v52 = vmul.f32 1.442695, %v932_v50  ;;  %v994_v2 = vmul.f32 1.442695, %v933_v60  ;;  %1031 = vadd.xlane.f32.xlu1 %v1030_v27 }
 0x3d3   : > { %v2842_v3 = vpop.eup %1911  ;;  %v903_v11 = vpop.xlane.xlu1 %902 }
 0x3d4   : > { %1921 = vpow2.f32 %v992_v52  ;;  %v934_v7 = vsub.f32 %v2734_v33, %v903_v11  ;;  %v935_v55 = vsub.f32 %v2736_v34, %v903_v11  ;;  %v1033_v30 = vadd.f32 %v2842_v3, %v2840_v28 }
 0x3d5   : > { %1923 = vpow2.f32 %v994_v2 }
 0x3d6   : > { %v2848_v31 = vpop.eup %1913  ;;  %v996_v10 = vmul.f32 1.442695, %v934_v7  ;;  %v998_v59 = vmul.f32 1.442695, %v935_v55  ;;  %1034 = vadd.xlane.f32.xlu1 %v1033_v30 }
 0x3d7   : > { %v2850_v13 = vpop.eup %1915  ;;  %v494_v14 = vpop.permute.xlu1 %493 }
 0x3d8   : > { %1925 = vpow2.f32 %v996_v10  ;;  %v1036_v19 = vadd.f32 %v2850_v13, %v2848_v31  ;;  %v2855_v33 = vadd.f32 %v2742_v38, %v494_v14 }
 0x3d9   : > { %1927 = vpow2.f32 %v998_v59 }
 0x3da   : > { %v2857_v34 = vpop.eup %1917  ;;  %1037 = vadd.xlane.f32.xlu1 %v1036_v19 }
 0x3db   : > { %v2859_v23 = vpop.eup %1919 }
 0x3dc   : > { %v1039_v61 = vadd.f32 %v2859_v23, %v2857_v34 }
 0x3de   : > { %v2863_v29 = vpop.eup %1921  ;;  %1040 = vadd.xlane.f32.xlu0 %v1039_v61 }
 0x3df   : > { %v2865_v32 = vpop.eup %1923 }
 0x3e0   : > { %v1042_v17 = vadd.f32 %v2865_v32, %v2863_v29 }
 0x3e2   : > { %v2869_v36 = vpop.eup %1925  ;;  %1043 = vadd.xlane.f32.xlu1 %v1042_v17 }
 0x3e3   : > { %v2871_v38 = vpop.eup %1927 }
 0x3e4   : > { %v1045_v39 = vadd.f32 %v2871_v38, %v2869_v36 }
 0x3e6   : > { %1046 = vadd.xlane.f32.xlu0 %v1045_v39 }
 0x3f3   : > { %503 = vperm.xlu1 %1863, %v489_v0  }
 0x3f7   : > { %508 = vperm.xlu1 %1863, %v490_v20  }
 0x3fc   : > { %498 = vperm.xlu0 %1864, %v488_v44  }
 0x437   : > { %v1002_v45 = vpop.xlane.xlu1 %1001 }
 0x438   : > { %1929 = vrcp.f32 %v1002_v45 }
 0x43b   : > { %v1005_v4 = vpop.xlane.xlu1 %1004 }
 0x43c   : > { %1931 = vrcp.f32 %v1005_v4 }
 0x43f   : > { %v1008_v47 = vpop.xlane.xlu1 %1007 }
 0x440   : > { %1933 = vrcp.f32 %v1008_v47 }
 0x442   : > { %v1930_v24 = vpop.eup %1929 }
 0x443   : > { %v1011_v48 = vpop.xlane.xlu1 %1010  ;;  %v1065_v8 = vmul.f32 %v1930_v24, %v2754_v5  ;;  %v1064_v60 = vmul.f32 %v1930_v24, %v2752_v53 }
 0x444   : > { %1935 = vrcp.f32 %v1011_v48 }
 0x446   : > { %v1932_v54 = vpop.eup %1931 }
 0x447   : > { %v1014_v57 = vpop.xlane.xlu1 %1013  ;;  %v1067_v50 = vmul.f32 %v1932_v54, %v2762_v16  ;;  %v1066_v27 = vmul.f32 %v1932_v54, %v2760_v58 }
 0x448   : > { %1937 = vrcp.f32 %v1014_v57 }
 0x449   : > { %v1679_v52 = vpack.c.bf16 %v1067_v50, %v1065_v8  ;;  %v1681_v2 = vpack.c.bf16 %v1066_v27, %v1064_v60 }
 0x44a   : > { %v1934_v7 = vpop.eup %1933 }
 0x44b   : > { %v1017_v11 = vpop.xlane.xlu1 %1016  ;;  %1680 = vmatprep.subr.bf16.mxu0 %v1679_v52  ;;  %v1069_v10 = vmul.f32 %v1934_v7, %v2770_v35  ;;  %v1068_v16 = vmul.f32 %v1934_v7, %v2768_v62 }
 0x44c   : > { %1939 = vrcp.f32 %v1017_v11  ;;  %1682 = vmatpush1.bf16.msra.mxu0 %v1681_v2 }
 0x44e   : > { %v1936_v55 = vpop.eup %1935 }
 0x44f   : > { %v1020_v30 = vpop.xlane.xlu1 %1019  ;;  %v1071_v5 = vmul.f32 %v1936_v55, %v2778_v43  ;;  %v1070_v53 = vmul.f32 %v1936_v55, %v2776_v1 }
 0x450   : > { %1941 = vrcp.f32 %v1020_v30 }
 0x451   : > { %v1683_v59 = vpack.c.bf16 %v1071_v5, %v1069_v10  ;;  %v1685_v58 = vpack.c.bf16 %v1070_v53, %v1068_v16 }
 0x452   : > { %v1938_v19 = vpop.eup %1937 }
 0x453   : > { %v1023_v14 = vpop.xlane.xlu1 %1022  ;;  %1684 = vmatprep.subr.bf16.mxu0 %v1683_v59  ;;  %v1073_v39 = vmul.f32 %v1938_v19, %v2786_v51  ;;  %v1072_v43 = vmul.f32 %v1938_v19, %v2784_v6 }
 0x454   : > { %1943 = vrcp.f32 %v1023_v14  ;;  %1686 = vmatpush1.bf16.msra.mxu0 %v1685_v58 }
 0x456   : > { %v1940_v61 = vpop.eup %1939 }
 0x457   : > { %v1026_v17 = vpop.xlane.xlu1 %1025  ;;  %v1075_v35 = vmul.f32 %v1940_v61, %v2794_v63  ;;  %v1074_v62 = vmul.f32 %v1940_v61, %v2792_v9 }
 0x458   : > { %1945 = vrcp.f32 %v1026_v17 }
 0x459   : > { %v1687_v0 = vpack.c.bf16 %v1075_v35, %v1073_v39  ;;  %v1689_v1 = vpack.c.bf16 %v1074_v62, %v1072_v43 }
 0x45a   : > { %v1942_v44 = vpop.eup %1941 }
 0x45b   : > { %v1029_v20 = vpop.xlane.xlu1 %1028  ;;  %1688 = vmatprep.subr.bf16.mxu0 %v1687_v0  ;;  %v1077_v47 = vmul.f32 %v1942_v44, %v2802_v56  ;;  %v1076_v63 = vmul.f32 %v1942_v44, %v2800_v12  ;;  %v1103_v0 = vld [vmem:[#allocation3 + $0x18] sm:$0xff] }
 0x45c   : > { %1947 = vrcp.f32 %v1029_v20  ;;  %1690 = vmatpush1.bf16.msra.mxu0 %v1689_v1 }
 0x45e   : > { %v1944_v45 = vpop.eup %1943 }
 0x45f   : > { %v1032_v4 = vpop.xlane.xlu1 %1031  ;;  %v1079_v51 = vmul.f32 %v1944_v45, %v2810_v26  ;;  %v1078_v6 = vmul.f32 %v1944_v45, %v2808_v15 }
 0x460   : > { %1949 = vrcp.f32 %v1032_v4  ;;  %v1104_v4 = vld [vmem:[#allocation3 + $0x20] sm:$0xff] }
 0x461   : > { %v1691_v48 = vpack.c.bf16 %v1079_v51, %v1077_v47  ;;  %v1693_v9 = vpack.c.bf16 %v1078_v6, %v1076_v63  ;;  %v1105_v47 = vld [vmem:[#allocation3 + $0x28] sm:$0xff] }
 0x462   : > { %v1946_v54 = vpop.eup %1945 }
 0x463   : > { %v1035_v24 = vpop.xlane.xlu1 %1034  ;;  %1692 = vmatprep.subr.bf16.mxu0 %v1691_v48  ;;  %v1081_v50 = vmul.f32 %v1946_v54, %v2818_v40  ;;  %v1080_v26 = vmul.f32 %v1946_v54, %v2816_v18  ;;  %v1106_v48 = vld [vmem:[#allocation3 + $0x30] sm:$0xff] }
 0x464   : > { %1951 = vrcp.f32 %v1035_v24  ;;  %1694 = vmatpush1.bf16.msra.mxu0 %v1693_v9  ;;  %v1107_v9 = vld [vmem:[#allocation3 + $0x38] sm:$0xff] }
 0x466   : > { %v1948_v57 = vpop.eup %1947 }
 0x467   : > { %v1038_v8 = vpop.xlane.xlu1 %1037  ;;  %v1083_v56 = vmul.f32 %v1948_v57, %v2826_v46  ;;  %v1082_v12 = vmul.f32 %v1948_v57, %v2824_v21 }
 0x468   : > { %1953 = vrcp.f32 %v1038_v8 }
 0x469   : > { %v1695_v60 = vpack.c.bf16 %v1083_v56, %v1081_v50  ;;  %v1697_v15 = vpack.c.bf16 %v1082_v12, %v1080_v26  ;;  %v1108_v50 = vld [vmem:[#allocation3 + $0x40] sm:$0xff]  ;;  %v1109_v56 = vld [vmem:[#allocation3 + $0x48] sm:$0xff] }
 0x46a   : > { %v1950_v52 = vpop.eup %1949 }
 0x46b   : > { %v1041_v27 = vpop.xlane.xlu0 %1040  ;;  %1696 = vmatprep.subr.bf16.mxu0 %v1695_v60  ;;  %v1085_v7 = vmul.f32 %v1950_v52, %v2834_v49  ;;  %v1084_v46 = vmul.f32 %v1950_v52, %v2832_v25 }
 0x46c   : > { %1955 = vrcp.f32 %v1041_v27  ;;  %1698 = vmatpush1.bf16.msra.mxu0 %v1697_v15 }
 0x46e   : > { %v1952_v2 = vpop.eup %1951 }
 0x46f   : > { %v1044_v11 = vpop.xlane.xlu1 %1043  ;;  %v1087_v40 = vmul.f32 %v1952_v2, %v2842_v3  ;;  %v1086_v18 = vmul.f32 %v1952_v2, %v2840_v28  ;;  %v2260_v2 = vmov (!%p1629_p0), 0.0  }
 0x470   : > { %1957 = vrcp.f32 %v1044_v11  ;;  %1397 = vmatprep.mubr.f32.mxu1 (!%p1629_p0), %v2260_v2  ;;  %v1255_v11 = vlaneseq (!%p1629_p0) }
 0x471   : > { %v1699_v55 = vpack.c.bf16 %v1087_v40, %v1085_v7  ;;  %v1701_v21 = vpack.c.bf16 %v1086_v18, %v1084_v46  ;;  %v2261_v7 = vmov (!%p1629_p0), 0   ;;  %v1287_v46 = vld [vmem:[#allocation14 + $0x10] sm:$0xff] (!%p1629_p0)  ;;  %v1285_v18 = vld [vmem:[#allocation14] sm:$0xff] (!%p1629_p0) }
 0x472   : > { %v1954_v5 = vpop.eup %1953  ;;  %1962 = vset.pattern.permute.xlu1 (!%p1629_p0), %v2261_v7  ;;  %1961 = vset.pattern.permute.xlu0 (!%p1629_p0), %v2261_v7  ;;  %v1256_v40 = vshrl.u32 (!%p1629_p0), %v1255_v11, 7 }
 0x473   : > { %v504_v30 = vpop.permute.xlu1 %503  ;;  %v1047_v10 = vpop.xlane.xlu0 %1046  ;;  %1700 = vmatprep.subr.bf16.mxu0 %v1699_v55  ;;  %v1089_v49 = vmul.f32 %v1954_v5, %v2850_v13  ;;  %v1088_v25 = vmul.f32 %v1954_v5, %v2848_v31  ;;  %1301 = vperm.xlu1 (!%p1629_p0), %1962, %v1287_v46   ;;  %v1288_v55 = vld [vmem:[#allocation14 + $0x18] sm:$0xff] (!%p1629_p0) }
 0x474   : > { %1959 = vrcp.f32 %v1047_v10  ;;  %v601_v16 = vadd.f32 %v2877_v42, %v504_v30  ;;  %1702 = vmatpush1.bf16.msra.mxu0 %v1701_v21  ;;  %1291 = vperm.xlu0 (!%p1629_p0), %1961, %v1285_v18   ;;  %v1286_v21 = vld [vmem:[#allocation14 + $0x8] sm:$0xff] (!%p1629_p0)  ;;  %v1261_v30 = vsub.s32 (!%p1629_p0), 1, %v1256_v40  ;;  %v1257_v10 = vsub.s32 (!%p1629_p0), 0, %v1256_v40 }
 0x476   : > { %v1956_v53 = vpop.eup %1955 }
 0x477   : > { %v509_v59 = vpop.permute.xlu1 %508  ;;  %v1091_v3 = vmul.f32 %v1956_v53, %v2859_v23  ;;  %v1090_v28 = vmul.f32 %v1956_v53, %v2857_v34  ;;  %1306 = vperm.xlu1 (!%p1629_p0), %1962, %v1288_v55  }
 0x478   : > { %v606_v58 = vadd.f32 %v2875_v41, %v509_v59  ;;  %1296 = vperm.xlu0 (!%p1629_p0), %1961, %v1286_v21   ;;  %v2923_v59 = vld [vmem:[%s2569_s16 + $0x8] sm:$0xff] (!%p1629_p0) }
 0x479   : > { %v1703_v14 = vpack.c.bf16 %v1091_v3, %v1089_v49  ;;  %v1705_v19 = vpack.c.bf16 %v1090_v28, %v1088_v25  ;;  %v2926_v49 = vld [vmem:[%s2569_s16 + $0x18] sm:$0xff] (!%p1629_p0) }
 0x47a   : > { %v1958_v17 = vpop.eup %1957 }
 0x47b   : > { %v499_v61 = vpop.permute.xlu0 %498  ;;  %1704 = vmatprep.subr.bf16.mxu0 %v1703_v14  ;;  %v1093_v35 = vmul.f32 %v1958_v17, %v2865_v32  ;;  %v1092_v23 = vmul.f32 %v1958_v17, %v2863_v29  ;;  %v1100_v29 = vld [vmem:[#allocation3] sm:$0xff]  ;;  %v1101_v32 = vld [vmem:[#allocation3 + $0x8] sm:$0xff] }
 0x47c   : > { %v596_v42 = vadd.f32 %v2740_v37, %v499_v61  ;;  %1706 = vmatpush1.bf16.msra.mxu0 %v1705_v19  ;;  %v1114_v37 = vld [vmem:[#allocation4 + $0x20] sm:$0xff] }
 0x47e   : > { %v1960_v39 = vpop.eup %1959 }
 0x47f   : > { %v1095_v13 = vmul.f32 %v1960_v39, %v2871_v38  ;;  %v1094_v31 = vmul.f32 %v1960_v39, %v2869_v36  ;;  %v2930_v39 = vld [vmem:[%s2569_s16 + $0x10] sm:$0xff] (!%p1629_p0) }
 0x481   : > { %v1707_v34 = vpack.c.bf16 %v1095_v13, %v1093_v35  ;;  %v1709_v43 = vpack.c.bf16 %v1094_v31, %v1092_v23  ;;  %v2933_v35 = vld [vmem:[%s2569_s16 + $0x28] sm:$0xff] (!%p1629_p0) }
 0x483   : > { %1708 = vmatprep.subr.bf16.mxu0 %v1707_v34 }
 0x484   : > { %1710 = vmatpush1.bf16.msra.mxu0 %v1709_v43  ;;  %v2936_v43 = vld [vmem:[%s2569_s16 + $0x38] sm:$0xff] (!%p1629_p0) }
 0x487   : > { %1180 = vmatmul.mubr.f32.vlgmr.msra.gmra.mrb[4].mxu0 %v2855_v33  ;;  %v1102_v33 = vld [vmem:[#allocation3 + $0x10] sm:$0xff] }
 0x488   : > { %1185 = vmatprep.mubr.f32.mxu0 %v2258_v22 }
 0x48b   : > { %1186 = vmatmul.mubr.f32.gmra.mrb[6].mxu0 %v596_v42  ;;  %v1234_v42 = vld [vmem:[%s2569_s16] sm:$0xff] (!%p1629_p0) }
 0x48c   : > { %1191 = vmatprep.mubr.f32.mxu0 %v2258_v22 }
 0x48f   : > { %1192 = vmatmul.mubr.f32.gmra.mrb[8].mxu0 %v601_v16 }
 0x490   : > { %1197 = vmatprep.mubr.f32.mxu0 %v2258_v22 }
 0x493   : > { %1198 = vmatmul.mubr.f32.gmra.mrb[10].mxu0 %v606_v58 }
 0x494   : > { %1203 = vmatprep.mubr.f32.mxu0 %v2258_v22 }
 0x497   : > { %1204 = vmatmul.mubr.f32.gmra.mrb[12].mxu0 %v1114_v37  ;;  %v1238_v37 = vld [vmem:[%s2569_s16 + $0x20] sm:$0xff] (!%p1629_p0) }
 0x498   : > { %1385 = vmatprep.mubr.f32.mxu0 (!%p1629_p0), %v2260_v2 }
 0x55a   : > { %v1181_v36 = vpop.f32.mrb[4].mxu0 }
 0x55b   : > { %v1210_v38 = vadd.f32 %v1181_v36, %v1100_v29  ;;  %v1183_v41 = vpop.f32.mrb[5].mxu0  ;;  %v2940_v29 = vld [vmem:[%s2569_s16 + $0x30] sm:$0xff] (!%p1629_p0) }
 0x55c   : > { %v1211_v62 = vadd.f32 %v1183_v41, %v1101_v32 }
 0x55d   : > { %1220 = vst [vmem:[#allocation3] sm:$0xff] %v1210_v38 }
 0x55e   : > { %1221 = vst [vmem:[#allocation3 + $0x8] sm:$0xff] %v1211_v62  ;;  %v1187_v1 = vpop.f32.mrb[6].mxu0 }
 0x55f   : > { %v1212_v20 = vadd.f32 %v1187_v1, %v1102_v33  ;;  %v1189_v44 = vpop.f32.mrb[7].mxu0 }
 0x560   : > { %v1213_v45 = vadd.f32 %v1189_v44, %v1103_v0 }
 0x561   : > { %1222 = vst [vmem:[#allocation3 + $0x10] sm:$0xff] %v1212_v20 }
 0x562   : > { %1223 = vst [vmem:[#allocation3 + $0x18] sm:$0xff] %v1213_v45  ;;  %v1193_v22 = vpop.f32.mrb[8].mxu0 }
 0x563   : > { %v1214_v51 = vadd.f32 %v1193_v22, %v1104_v4  ;;  %v1195_v63 = vpop.f32.mrb[9].mxu0 }
 0x564   : > { %v1215_v6 = vadd.f32 %v1195_v63, %v1105_v47  ;;  %v1246_v3 = vld [vmem:[#allocation3] sm:$0xff] (!%p1629_p0) }
 0x565   : > { %1224 = vst [vmem:[#allocation3 + $0x20] sm:$0xff] %v1214_v51  ;;  %v1247_v5 = vld [vmem:[#allocation3 + $0x8] sm:$0xff] (!%p1629_p0) }
 0x566   : > { %1225 = vst [vmem:[#allocation3 + $0x28] sm:$0xff] %v1215_v6  ;;  %v1199_v24 = vpop.f32.mrb[10].mxu0  ;;  %v1281_v6 = vld [vmem:[#allocation13] sm:$0xff] (!%p1629_p0) }
 0x567   : > { %v1216_v54 = vadd.f32 %v1199_v24, %v1106_v48  ;;  %v1201_v57 = vpop.f32.mrb[11].mxu0  ;;  %v1283_v48 = vld [vmem:[#allocation13 + $0x10] sm:$0xff] (!%p1629_p0)  ;;  %v1284_v24 = vld [vmem:[#allocation13 + $0x18] sm:$0xff] (!%p1629_p0) }
 0x568   : > { %v1217_v8 = vadd.f32 %v1201_v57, %v1107_v9  ;;  %1233 = sbr.rel (%p1629_p0) target bundleno = 1651 (0x673), region = 76  ;;  %v1248_v25 = vld [vmem:[#allocation3 + $0x10] sm:$0xff] (!%p1629_p0)  ;;  %v1282_v9 = vld [vmem:[#allocation13 + $0x8] sm:$0xff] (!%p1629_p0)  ;;  %v1292_v57 = vpop.permute.xlu0 (!%p1629_p0), %1291 }
 0x569   : > { %1226 = vst [vmem:[#allocation3 + $0x30] sm:$0xff] %v1216_v54  ;;  %v1249_v16 = vld [vmem:[#allocation3 + $0x18] sm:$0xff] (!%p1629_p0)  ;;  %v1302_v54 = vpop.permute.xlu1 (!%p1629_p0), %1301 }
 0x56a   : > { %1227 = vst [vmem:[#allocation3 + $0x38] sm:$0xff] %v1217_v8  ;;  %v1205_v26 = vpop.f32.mrb[12].mxu0 }
 0x56b   : > { %v1218_v12 = vadd.f32 %v1205_v26, %v1108_v50  ;;  %v1207_v60 = vpop.f32.mrb[13].mxu0 }
 0x56c   : > { %v1219_v15 = vadd.f32 %v1207_v60, %v1109_v56  ;;  %v1250_v61 = vld [vmem:[#allocation3 + $0x20] sm:$0xff] (!%p1629_p0) }
 0x56d   : > { %1228 = vst [vmem:[#allocation3 + $0x40] sm:$0xff] %v1218_v12  ;;  %v1251_v28 = vld [vmem:[#allocation3 + $0x28] sm:$0xff] (!%p1629_p0)  ;;  %v1307_v7 = vpop.permute.xlu1 (!%p1629_p0), %1306 }
 0x56e   : > { %1229 = vst [vmem:[#allocation3 + $0x48] sm:$0xff] %v1219_v15 }
 0x570   : > { %v1252_v17 = vld [vmem:[#allocation3 + $0x30] sm:$0xff] }
 0x571   : > { %v1253_v19 = vld [vmem:[#allocation3 + $0x38] sm:$0xff] }
 0x575   : > { %v1243_v27 = vld [vmem:[#allocation3 + $0x40] ss:$8 sm:$0x3] }
 0x576   : > { %v1244_v52 = vadd.f32 1e-09, %v1243_v27 }
 0x578   : > { %1963 = vrcp.f32 %v1244_v52 }
 0x582   : > { %v1964_v53 = vpop.eup %1963 }
 0x583   : > { %v1262_v58 = vrot.slane %v1964_v53, %v1261_v30  ;;  %v1258_v14 = vrot.slane %v1964_v53, %v1257_v10 }
 0x585   : > { %v1266_v13 = vmul.f32 %v1262_v58, %v1247_v5  ;;  %v1268_v23 = vmul.f32 %v1262_v58, %v1249_v16  ;;  %v1265_v31 = vmul.f32 %v1258_v14, %v1246_v3  ;;  %v1267_v34 = vmul.f32 %v1258_v14, %v1248_v25 }
 0x586   : > { %v1270_v32 = vmul.f32 %v1262_v58, %v1251_v28  ;;  %v1272_v36 = vmul.f32 %v1262_v58, %v1253_v19  ;;  %v1269_v38 = vmul.f32 %v1258_v14, %v1250_v61  ;;  %v1271_v41 = vmul.f32 %v1258_v14, %v1252_v17 }
 0x587   : > { %v1274_v62 = vsub.f32 %v2923_v59, %v1266_v13  ;;  %v1276_v33 = vsub.f32 %v2926_v49, %v1268_v23  ;;  %v1273_v0 = vsub.f32 %v1234_v42, %v1265_v31  ;;  %v1275_v1 = vsub.f32 %v2930_v39, %v1267_v34 }
 0x588   : > { %v1278_v20 = vsub.f32 %v2933_v35, %v1270_v32  ;;  %v1280_v44 = vsub.f32 %v2936_v43, %v1272_v36  ;;  %v1277_v45 = vsub.f32 %v1238_v37, %v1269_v38  ;;  %v1279_v4 = vsub.f32 %v2940_v29, %v1271_v41 }
 0x589   : > { %v1711_v47 = vpack.c.bf16 %v1276_v33, %v1274_v62  ;;  %v1713_v22 = vpack.c.bf16 %v1275_v1, %v1273_v0 }
 0x58a   : > { %v1715_v51 = vpack.c.bf16 %v1280_v44, %v1278_v20  ;;  %v1717_v63 = vpack.c.bf16 %v1279_v4, %v1277_v45 }
 0x58b   : > { %1712 = vmatprep.subr.bf16.mxu0 %v1711_v47  ;;  %1719 = vmatprep.subr.bf16.mxu1 %v1711_v47 }
 0x58c   : > { %1714 = vmatpush1.bf16.msra.mxu0 %v1713_v22  ;;  %1721 = vmatpush1.bf16.msra.mxu1 %v1713_v22 }
 0x58d   : > { %1716 = vmatprep.subr.bf16.mxu0 %v1715_v51  ;;  %1720 = vmatprep.subr.bf16.mxu1 %v1715_v51 }
 0x590   : > { %1718 = vmatpush1.bf16.msra.mxu0 %v1717_v63  ;;  %1722 = vmatpush1.bf16.msra.mxu1 %v1717_v63 }
 0x593   : > { %1630 = vmatmul.mubr.msk.f32.vlgmr.msra.gmra.mrb[0].mxu0 %vm511_vm3, %v1281_v6  ;;  %1632 = vmatmul.mubr.msk.f32.vlgmr.msra.gmra.mrb[0].mxu1 %vm511_vm3, %v1283_v48 }
 0x594   : > { %1391 = vmatprep.mubr.f32.mxu0 %v2260_v2  ;;  %1403 = vmatprep.mubr.f32.mxu1 %v2260_v2  ;;  %v1297_v2 = vpop.permute.xlu0 %1296 }
 0x597   : > { %1631 = vmatmul.mubr.msk.f32.gmra.mrb[2].mxu0 %vm511_vm3, %v1282_v9  ;;  %1633 = vmatmul.mubr.msk.f32.gmra.mrb[2].mxu1 %vm511_vm3, %v1284_v24 }
 0x666   : > { %v1387_v8 = vpop.f32.mrb[0].mxu0  ;;  %v1399_v50 = vpop.f32.mrb[0].mxu1 }
 0x667   : > { %v1388_v56 = vadd.f32 %v1387_v8, %v1292_v57  ;;  %v1400_v26 = vadd.f32 %v1399_v50, %v1302_v54  ;;  %v1389_v12 = vpop.f32.mrb[1].mxu0  ;;  %v1401_v60 = vpop.f32.mrb[1].mxu1 }
 0x668   : > { %v1390_v15 = vadd.f32 %v1389_v12, %v1292_v57  ;;  %v1402_v27 = vadd.f32 %v1401_v60, %v1302_v54 }
 0x669   : > { %v1410_v52 = vmax.f32 %v1388_v56, 0.0  ;;  %v1414_v11 = vmax.f32 %v1400_v26, 0.0 }
 0x66a   : > { %v1411_v40 = vmax.f32 %v1390_v15, 0.0  ;;  %v1415_v46 = vmax.f32 %v1402_v27, 0.0  ;;  %v1393_v18 = vpop.f32.mrb[2].mxu0  ;;  %v1405_v55 = vpop.f32.mrb[2].mxu1 }
 0x66b   : > { %v1418_v21 = vadd.f32 %v1410_v52, %v1234_v42  ;;  %v1422_v30 = vadd.f32 %v1414_v11, %v1238_v37  ;;  %v1394_v10 = vadd.f32 %v1393_v18, %v1297_v2  ;;  %v1406_v5 = vadd.f32 %v1405_v55, %v1307_v7  ;;  %v1395_v16 = vpop.f32.mrb[3].mxu0  ;;  %v1407_v53 = vpop.f32.mrb[3].mxu1 }
 0x66c   : > { %v1419_v3 = vadd.f32 %v1411_v40, %v2923_v59  ;;  %v1423_v25 = vadd.f32 %v1415_v46, %v2933_v35  ;;  %v1396_v28 = vadd.f32 %v1395_v16, %v1297_v2  ;;  %v1408_v58 = vadd.f32 %v1407_v53, %v1307_v7 }
 0x66d   : > { %1426 = vst [vmem:[%s2587_s7] sm:$0xff] %v1418_v21  ;;  %1430 = vst [vmem:[%s2587_s7 + $0x20] sm:$0xff] %v1422_v30  ;;  %v1412_v14 = vmax.f32 %v1394_v10, 0.0  ;;  %v1416_v19 = vmax.f32 %v1406_v5, 0.0 }
 0x66e   : > { %1427 = vst [vmem:[%s2587_s7 + $0x8] sm:$0xff] %v1419_v3  ;;  %1431 = vst [vmem:[%s2587_s7 + $0x28] sm:$0xff] %v1423_v25  ;;  %v1413_v61 = vmax.f32 %v1396_v28, 0.0  ;;  %v1417_v17 = vmax.f32 %v1408_v58, 0.0 }
 0x66f   : > { %v1420_v42 = vadd.f32 %v1412_v14, %v2930_v39  ;;  %v1424_v59 = vadd.f32 %v1416_v19, %v2940_v29 }
 0x670   : > { %v1421_v13 = vadd.f32 %v1413_v61, %v2926_v49  ;;  %v1425_v35 = vadd.f32 %v1417_v17, %v2936_v43 }
 0x671   : > { %1428 = vst [vmem:[%s2587_s7 + $0x10] sm:$0xff] %v1420_v42  ;;  %1432 = vst [vmem:[%s2587_s7 + $0x30] sm:$0xff] %v1424_v59 }
 0x672   : > { %1429 = vst [vmem:[%s2587_s7 + $0x18] sm:$0xff] %v1421_v13  ;;  %1433 = vst [vmem:[%s2587_s7 + $0x38] sm:$0xff] %v1425_v35 }
 0x673 PF: > { %s1640_s24 = sshll.u32 %s2233_s25, 10  ;;  %s3060_s1 = sld [smem:[#allocation24_spill]] }
 0x674   : > { %s1448_s11 = sshll.u32 %s2587_s7, 4  ;;  %s1435_s13 = scalar_lea.sflag [#allocation7], %s2565_s10  ;;  %s2975_s11 = int_to_ptr.vmem [resolvable:$true] %s1448_s11 }
 0x675   : > { %s2135_s16 = scalar_lea.vmem %s2975_s11, 1024  ;;  %p3061_p1 = scmp.ne.s32.totalorder %s3055_s8, 0 }
 0x676   : > { %p2136_p7 = scmp.ne.s32.totalorder %s2975_s11, %s2135_s16  ;;  %s2262_s30 = smov [#allocation16]  }
 0x677   : > { %s2139_s29 = sshll.u32 %s2262_s30, 4  ;;  %s2140_s29 = int_to_ptr.vmem [resolvable:$false] %s2139_s29 }
 0x678   : > { %p2137_p12 = pnand %p2136_p7, %p3061_p1  ;;  %s2141_s25 = scalar_lea.vmem %s2140_s29, 2048 }
 0x679   : > { %s2972_s12 = scalar_lea.hbm %s3060_s1, %s1640_s24  ;;  %p2142_p4 = scmp.lt.s32.totalorder %s2975_s11, %s2140_s29 }
 0x67a   : > { %p2138_p2 = pneg %p2137_p12  ;;  %p2143_p6 = scmp.lt.s32.totalorder %s2141_s25, %s2135_s16 }
 0x67c   : > { %p2144_p5 = por %p2143_p6, %p2142_p4 }
 0x67e   : > { %p2145_p9 = pnand %p2144_p5, %p2138_p2 }
 0x680   : > { %2148 = shalt.err (!%p2145_p9)
}
 0x681   : > { %s2149_s7 = scalar_lea.hbm %s2972_s12, 1024  ;;  %s2153_s19 = scalar_lea.hbm %s3060_s1, 2048 }
 0x682   : > { %p2150_p3 = scmp.ne.s32.totalorder %s2972_s12, %s2149_s7  ;;  %p2154_p13 = scmp.lt.u32.totalorder %s2972_s12, %s3060_s1 }
 0x683   : > { %p2155_p11 = scmp.lt.u32.totalorder %s2153_s19, %s2149_s7  ;;  %p2157_p7 = scmp.lt.u32.totalorder %s2149_s7, %s2972_s12 }
 0x684   : > { %p2151_p10 = pnand %p2150_p3, %p3061_p1 }
 0x685   : > { %p2156_p0 = por %p2155_p11, %p2154_p13 }
 0x686   : > { %p2152_p8 = pneg %p2151_p10 }
 0x687   : > { %p2158_p12 = por %p2157_p7, %p2156_p0 }
 0x689   : > { %p2159_p2 = pnand %p2158_p12, %p2152_p8 }
 0x68b   : > { %2162 = shalt.err (!%p2159_p2)
}
 0x68c   : > { %s2263_s18 = smov 256   ;;  %s2264_s16 = smov 16  }
 0x68d   : > { %1745 = dma.vmem_to_hbm [thread:$0]  (%p3061_p1), %s2975_s11, 1024, %s2972_s12, %s1435_s13, %s2263_s18, %s2263_s18, %s2264_s16  }
 0x68e PF: > { %p1782_p4 = scmp.ge.s32.totalorder %s2245_s28, 2  ;;  %s1463_s30 = sand.u32 1, %s2217_s21  }
 0x68f   : > { %p3062_p6 = scmp.ne.s32.totalorder %s3056_s17, 0  ;;  %s1464_s29 = scalar_lea.sflag [#allocation7], %s1463_s30 }
 0x691   : > { %p1768_p5 = pnand %p1782_p4, %p3062_p6 }
 0x693   : > { %2212 = dma.done.wait (!%p1768_p5), %s1464_s29, 1024  }
 0x694   : > { %2214 = vsyncadd (!%p1768_p5), %s1464_s29, 4294966272  ;;  %s25_s28 = sadd.s32 1, %s2245_s28   ;;  %s3063_s21 = smov %s2221_s22 }
 0x695   : > { %p22_p9 = scmp.ge.s32.totalorder %s25_s28, 6   ;;  %s3064_s22 = smov %s2225_s23 }
 0x696   : > { %s3065_s23 = smov %s2518_s9  ;;  %s3066_s24 = smov %s2237_s26 }
 0x697   : > { %s3067_s25 = smov %s2241_s27  ;;  %s3068_s26 = smov %s3071_s20 }
 0x698   : > { %s3069_s27 = smov %s3075_s3  ;;  %24 = sbr.rel (!%p22_p9) target bundleno = 14 (0xe), region = 120 }
 0x69f   :  { %1469 = vsyncpa [#allocation6], 1 }
 0x6a0   :  { %1471 = vsyncpa [#allocation6 + $0x1], 1 }
 0x6a1   :  { %1472 = vsyncpa [#allocation9], 1 }
 0x6a2   :  { %1473 = vsyncpa [#allocation12], 1 }
 0x6a3   :  { %1474 = vsyncpa [#allocation15], 1 }
 0x6a4   :  { %1475 = vsyncpa [#allocation7], 1 }
 0x6a5   :  { %1477 = vsyncpa [#allocation7 + $0x1], 1 }

</bundles_post_ra>
